<compile_context>
chip_gen: v7x
topology: tpu7x:2x2x1
jax: 0.10.0
libtpu: 0.0.40
codegen_flags: <defaults>
</compile_context>

<pallas_src>
import jax
import jax.numpy as jnp
from jax.experimental import pallas as pl
from jax.experimental.pallas import tpu as pltpu

MSE_WEIGHT = 1.0
CLAP_WEIGHT = 1.0
SR = 16000


# ----------------------------------------------------------------------------
# Fused Pallas kernel
# ----------------------------------------------------------------------------
def _clap_fused_kernel(lat_in_ref, lat_tgt_ref, gt_wav_ref, cap_ref,
                       w_dec_ref, w_aud_ref, w_txt_ref,
                       o_ref, feat_acc_ref):
    """Grid axis 0 iterates over waveform (L) tiles — a reduction axis for the
    audio-embedding accumulators; init / finalize are pl.when-gated."""
    l = pl.program_id(0)

    @pl.when(l == 0)
    def _init():
        feat_acc_ref[...] = jnp.zeros_like(feat_acc_ref)

    # ---- streamed decode + CLAP-audio projection for this L tile ---------------------
    # decode stand-in: (B, N) bf16 @ (N, TILE_L) bf16 -> (B, TILE_L) f32 (MXU, f32 acc)
    wav_tile = jnp.dot(lat_in_ref[...].astype(jnp.bfloat16), w_dec_ref[...],
                       preferred_element_type=jnp.float32)

    # Stack predicted- and ground-truth-wave tiles so a single MXU pass against the
    # shared w_audio panel produces both embedding contributions (M=2B instead of 2xM=B).
    stacked = jnp.concatenate([wav_tile, gt_wav_ref[...]], axis=0)        # (2B, TILE_L) f32
    feat_acc_ref[...] += jnp.dot(stacked.astype(jnp.bfloat16), w_aud_ref[...],
                                 preferred_element_type=jnp.float32)      # (2B, D) f32

    @pl.when(l == pl.num_programs(0) - 1)
    def _finalize():
        b = lat_in_ref.shape[0]

        # per-instance MSE over the flattened latent (mean over all non-batch dims), f32
        diff = lat_in_ref[...] - lat_tgt_ref[...]
        mse = jnp.mean(diff * diff, axis=1, keepdims=True)                # (B, 1)

        feat = feat_acc_ref[...]
        feat_in = feat[:b, :]                                             # audio emb (pred wav)
        feat_gt = feat[b:, :]                                             # audio emb (gt wav)
        # text-tower stand-in: (B, D_TXT) @ (D_TXT, D) -> (B, D)
        feat_txt = jnp.dot(cap_ref[...].astype(jnp.bfloat16), w_txt_ref[...],
                           preferred_element_type=jnp.float32)

        # F.cosine_similarity(dim=1) semantics: dot / max(||a||*||b||, eps)
        #   == dot * rsqrt(max(||a||^2 * ||b||^2, eps^2))   (EUP rsqrt, ||feat_in|| hoisted)
        eps2 = jnp.float32(1e-8) * jnp.float32(1e-8)
        w_ii = jnp.sum(feat_in * feat_in, axis=1, keepdims=True)
        w_tt = jnp.sum(feat_txt * feat_txt, axis=1, keepdims=True)
        w_gg = jnp.sum(feat_gt * feat_gt, axis=1, keepdims=True)
        w_it = jnp.sum(feat_in * feat_txt, axis=1, keepdims=True)
        w_ig = jnp.sum(feat_in * feat_gt, axis=1, keepdims=True)
        cos_it = w_it * jax.lax.rsqrt(jnp.maximum(w_ii * w_tt, eps2))
        cos_ig = w_ig * jax.lax.rsqrt(jnp.maximum(w_ii * w_gg, eps2))

        loss = MSE_WEIGHT * mse + CLAP_WEIGHT * (2.0 - cos_it - cos_ig)   # (B, 1)
        # lane-dense store: broadcast across the 128-lane output block -> unmasked vst
        o_ref[...] = jnp.broadcast_to(loss, o_ref.shape)


# ----------------------------------------------------------------------------
# Wrapper
# ----------------------------------------------------------------------------
def _pick_tile_l(l_eff):
    # 512 / 256 fill the 256-wide MXU on v6e/v7x and are 128-aligned for v5e's 128x128 MXU.
    # With N=1024 bf16 panels this is ~1 MiB per w_decode buffer (x2 double-buffer), far
    # under v7x's 64 MiB physical VMEM and every generation's scoped default.
    if l_eff >= 512:
        return 512
    if l_eff >= 256:
        return 256
    return 128


def _fit_length(x, axis, eff, pad_to):
    """Crop x along `axis` to `eff` samples, then zero-pad to `pad_to` (exact math:
    zero columns/rows contribute nothing to the embeddings). No-op at demo shapes."""
    if x.shape[axis] != eff:
        x = jax.lax.slice_in_dim(x, 0, eff, axis=axis)
    if eff != pad_to:
        pads = [(0, 0)] * x.ndim
        pads[axis] = (0, pad_to - eff)
        x = jnp.pad(x, pads)
    return x


def clap_loss_forward(inputs, target, gt_wav, captions, params):
    """reduction='instance' -> per-instance loss of shape (B,).
    ('mean'/'sum' would just be a wrapper-side jnp.mean / jnp.sum.)"""
    B = inputs.shape[0]
    lat_in = inputs.reshape(B, -1).astype(jnp.float32)     # spec: input.float()
    lat_tgt = target.reshape(B, -1).astype(jnp.float32)
    N = lat_in.shape[1]

    w_dec = params["w_decode"]          # (N, L)      bf16
    w_aud = params["w_audio"]           # (L, D)      bf16
    w_txt = params["w_text"]            # (D_TXT, D)  bf16
    L = w_dec.shape[1]
    D = w_aud.shape[1]
    D_TXT = captions.shape[1]

    # 10-second crop realized through the grid extent / index maps, not a host-side
    # slice of a materialized waveform.
    L_eff = min(L, SR * 10)
    TILE_L = _pick_tile_l(L_eff)
    num_tiles = pl.cdiv(L_eff, TILE_L)
    L_pad = num_tiles * TILE_L

    gt = gt_wav.astype(jnp.float32)
    if L_pad != L or gt.shape[1] != L_pad:
        w_dec = _fit_length(w_dec, axis=1, eff=L_eff, pad_to=L_pad)
        w_aud = _fit_length(w_aud, axis=0, eff=L_eff, pad_to=L_pad)
        gt = _fit_length(gt, axis=1, eff=min(gt.shape[1], L_eff), pad_to=L_pad)

    out = pl.pallas_call(
        _clap_fused_kernel,
        out_shape=jax.ShapeDtypeStruct((B, 128), jnp.float32),
        grid_spec=pltpu.PrefetchScalarGridSpec(
            num_scalar_prefetch=0,
            grid=(num_tiles,),                               # reduction over waveform tiles
            in_specs=[
                pl.BlockSpec((B, N), lambda l: (0, 0)),       # predicted latent (resident)
                pl.BlockSpec((B, N), lambda l: (0, 0)),       # target latent    (resident)
                pl.BlockSpec((B, TILE_L), lambda l: (0, l)),  # ground-truth wav tile
                pl.BlockSpec((B, D_TXT), lambda l: (0, 0)),   # captions         (resident)
                pl.BlockSpec((N, TILE_L), lambda l: (0, l)),  # w_decode column panel
                pl.BlockSpec((TILE_L, D), lambda l: (l, 0)),  # w_audio row panel
                pl.BlockSpec((D_TXT, D), lambda l: (0, 0)),   # w_text           (resident)
            ],
            out_specs=pl.BlockSpec((B, 128), lambda l: (0, 0)),
            scratch_shapes=[pltpu.VMEM((2 * B, D), jnp.float32)],   # stacked audio-emb acc
        ),
        compiler_params=pltpu.CompilerParams(
            # Single axis is a reduction over L-tiles -> "arbitrary". (A parallel axis for
            # v7x's 2nd TC isn't available in the fused form; at these shapes the kernel is
            # launch/DMA-latency bound and fusion dominates.)
            dimension_semantics=("arbitrary",),
            vmem_limit_bytes=32 * 1024 * 1024,
        ),
    )(lat_in, lat_tgt, gt, captions.astype(jnp.float32), w_dec, w_aud, w_txt)

    return out[:, 0]   # per-instance loss, shape (B,)


# ----------------------------------------------------------------------------
# Main
# ----------------------------------------------------------------------------
if __name__ == "__main__":
    B, C, H, W = 2, 4, 16, 16         # latent (NCHW, like PyTorch)
    N = C * H * W                     # 1024 flattened latent features
    L = 1024                          # synthetic decoded-waveform length
    D = 128                           # CLAP-style embedding dim
    D_TXT = 64                        # caption feature dim

    key = jax.random.PRNGKey(0)
    k1, k2, k3, k4, k5, k6, k7 = jax.random.split(key, 7)

    # deterministic synthetic "model" parameters, stored bf16 (MXU operands, f32 accumulate)
    params = {
        "w_decode": (jax.random.normal(k1, (N, L), jnp.float32)
                     * (1.0 / jnp.sqrt(N))).astype(jnp.bfloat16),
        "w_audio":  (jax.random.normal(k2, (L, D), jnp.float32)
                     * (1.0 / jnp.sqrt(L))).astype(jnp.bfloat16),
        "w_text":   (jax.random.normal(k3, (D_TXT, D), jnp.float32)
                     * (1.0 / jnp.sqrt(D_TXT))).astype(jnp.bfloat16),
    }

    # deterministic example inputs
    inputs = jax.random.normal(k4, (B, C, H, W), jnp.float32)
    target = jax.random.normal(k5, (B, C, H, W), jnp.float32)
    gt_wav = jax.random.normal(k6, (B, L), jnp.float32)
    captions = jax.random.normal(k7, (B, D_TXT), jnp.float32)

    loss = jax.jit(clap_loss_forward)(inputs, target, gt_wav, captions, params)
    loss = jax.block_until_ready(loss)

    assert loss.shape == (B,) and loss.dtype == jnp.float32
    assert bool(jnp.all(jnp.isfinite(loss)))
    print("KERNEL_OK")
</pallas_src>

<mosaic_0001>
module attributes {stable_mosaic.version = 11 : i64} {
  func.func @_clap_fused_kernel(%arg0: i32, %arg1: memref<2x1024xf32, #tpu.memory_space<vmem>>, %arg2: memref<2x1024xf32, #tpu.memory_space<vmem>>, %arg3: memref<2x512xf32, #tpu.memory_space<vmem>>, %arg4: memref<2x64xf32, #tpu.memory_space<vmem>>, %arg5: memref<1024x512xbf16, #tpu.memory_space<vmem>>, %arg6: memref<512x128xbf16, #tpu.memory_space<vmem>>, %arg7: memref<64x128xbf16, #tpu.memory_space<vmem>>, %arg8: memref<2x128xf32, #tpu.memory_space<vmem>>, %arg9: memref<4x128xf32, #tpu.memory_space<vmem>>) attributes {dimension_semantics = [#tpu.dimension_semantics<arbitrary>], iteration_bounds = array<i64: 2>, scalar_prefetch = 0 : i64, scratch_operands = 1 : i64, tpu.core_type = #tpu.core_type<tc>, window_params = [{pipeline_mode = #tpu.pipeline_mode<synchronous>, transform_indices = @transform_0, window_bounds = array<i64: 2, 1024>}, {pipeline_mode = #tpu.pipeline_mode<synchronous>, transform_indices = @transform_1, window_bounds = array<i64: 2, 1024>}, {transform_indices = @transform_2, window_bounds = array<i64: 2, 512>}, {pipeline_mode = #tpu.pipeline_mode<synchronous>, transform_indices = @transform_3, window_bounds = array<i64: 2, 64>}, {transform_indices = @transform_4, window_bounds = array<i64: 1024, 512>}, {transform_indices = @transform_5, window_bounds = array<i64: 512, 128>}, {pipeline_mode = #tpu.pipeline_mode<synchronous>, transform_indices = @transform_6, window_bounds = array<i64: 64, 128>}, {pipeline_mode = #tpu.pipeline_mode<synchronous>, transform_indices = @transform_7, window_bounds = array<i64: 2, 128>}]} {
    %c0_i32 = arith.constant 0 : i32
    %0 = arith.cmpi eq, %arg0, %c0_i32 : i32
    %1 = arith.extui %0 : i1 to i32
    %c0_i32_0 = arith.constant 0 : i32
    %2 = arith.cmpi ne, %1, %c0_i32_0 : i32
    scf.if %2 {
      %cst_14 = arith.constant 0.000000e+00 : f32
      %18 = vector.broadcast %cst_14 : f32 to vector<4x128xf32>
      %c0_15 = arith.constant 0 : index
      %c0_16 = arith.constant 0 : index
      %19 = vector.load %arg9[%c0_15, %c0_16] : memref<4x128xf32, #tpu.memory_space<vmem>>, vector<4x128xf32>
      tpu.vector_store %arg9[%c0_15, %c0_16], %18 {strides = array<i32>} : memref<4x128xf32, #tpu.memory_space<vmem>>, vector<4x128xf32>,
    } else {
    }
    %c0 = arith.constant 0 : index
    %c0_1 = arith.constant 0 : index
    %3 = vector.load %arg1[%c0, %c0_1] : memref<2x1024xf32, #tpu.memory_space<vmem>>, vector<2x1024xf32>
    %4 = arith.truncf %3 : vector<2x1024xf32> to vector<2x1024xbf16>
    %c0_2 = arith.constant 0 : index
    %c0_3 = arith.constant 0 : index
    %5 = vector.load %arg5[%c0_2, %c0_3] : memref<1024x512xbf16, #tpu.memory_space<vmem>>, vector<1024x512xbf16>
    %cst = arith.constant dense<0.000000e+00> : vector<2x512xf32>
    %6 = tpu.matmul %4, %5, %cst {dimension_numbers = #tpu.dot_dimension_numbers<[1], [0], [0], [1], [0, 0, 1, 1], [], []>} : vector<2x1024xbf16>, vector<1024x512xbf16>, vector<2x512xf32> -> vector<2x512xf32>
    %c0_4 = arith.constant 0 : index
    %c0_5 = arith.constant 0 : index
    %7 = vector.load %arg3[%c0_4, %c0_5] : memref<2x512xf32, #tpu.memory_space<vmem>>, vector<2x512xf32>
    %8 = tpu.concatenate %6, %7 in 0 : vector<2x512xf32>, vector<2x512xf32> -> vector<4x512xf32>
    %c0_6 = arith.constant 0 : index
    %c0_7 = arith.constant 0 : index
    %9 = vector.load %arg9[%c0_6, %c0_7] : memref<4x128xf32, #tpu.memory_space<vmem>>, vector<4x128xf32>
    %10 = arith.truncf %8 : vector<4x512xf32> to vector<4x512xbf16>
    %c0_8 = arith.constant 0 : index
    %c0_9 = arith.constant 0 : index
    %11 = vector.load %arg6[%c0_8, %c0_9] : memref<512x128xbf16, #tpu.memory_space<vmem>>, vector<512x128xbf16>
    %cst_10 = arith.constant dense<0.000000e+00> : vector<4x128xf32>
    %12 = tpu.matmul %10, %11, %cst_10 {dimension_numbers = #tpu.dot_dimension_numbers<[1], [0], [0], [1], [0, 0, 1, 1], [], []>} : vector<4x512xbf16>, vector<512x128xbf16>, vector<4x128xf32> -> vector<4x128xf32>
    %13 = arith.addf %9, %12 : vector<4x128xf32>
    %c0_11 = arith.constant 0 : index
    %c0_12 = arith.constant 0 : index
    %14 = vector.load %arg9[%c0_11, %c0_12] : memref<4x128xf32, #tpu.memory_space<vmem>>, vector<4x128xf32>
    tpu.vector_store %arg9[%c0_11, %c0_12], %13 {strides = array<i32>} : memref<4x128xf32, #tpu.memory_space<vmem>>, vector<4x128xf32>,
    %c1_i32 = arith.constant 1 : i32
    %15 = arith.cmpi eq, %arg0, %c1_i32 : i32
    %16 = arith.extui %15 : i1 to i32
    %c0_i32_13 = arith.constant 0 : i32
    %17 = arith.cmpi ne, %16, %c0_i32_13 : i32
    scf.if %17 {
      %c0_14 = arith.constant 0 : index
      %c0_15 = arith.constant 0 : index
      %18 = vector.load %arg1[%c0_14, %c0_15] : memref<2x1024xf32, #tpu.memory_space<vmem>>, vector<2x1024xf32>
      %c0_16 = arith.constant 0 : index
      %c0_17 = arith.constant 0 : index
      %19 = vector.load %arg2[%c0_16, %c0_17] : memref<2x1024xf32, #tpu.memory_space<vmem>>, vector<2x1024xf32>
      %20 = arith.subf %18, %19 : vector<2x1024xf32>
      %21 = arith.mulf %20, %20 : vector<2x1024xf32>
      %cst_18 = arith.constant dense<0.000000e+00> : vector<2xf32>
      %22 = vector.multi_reduction <add>, %21, %cst_18 [1] : vector<2x1024xf32> to vector<2xf32>
      %23 = vector.shape_cast %22 : vector<2xf32> to vector<2x1xf32>
      %cst_19 = arith.constant 1.024000e+03 : f32
      %24 = vector.broadcast %cst_19 : f32 to vector<2x1xf32>
      %25 = arith.divf %23, %24 : vector<2x1xf32>
      %c0_20 = arith.constant 0 : index
      %c0_21 = arith.constant 0 : index
      %26 = vector.load %arg9[%c0_20, %c0_21] : memref<4x128xf32, #tpu.memory_space<vmem>>, vector<4x128xf32>
      %27 = vector.extract_strided_slice %26 {offsets = [0, 0], sizes = [2, 128], strides = [1, 1]} : vector<4x128xf32> to vector<2x128xf32>
      %28 = vector.extract_strided_slice %26 {offsets = [2, 0], sizes = [2, 128], strides = [1, 1]} : vector<4x128xf32> to vector<2x128xf32>
      %c0_22 = arith.constant 0 : index
      %c0_23 = arith.constant 0 : index
      %29 = vector.load %arg4[%c0_22, %c0_23] : memref<2x64xf32, #tpu.memory_space<vmem>>, vector<2x64xf32>
      %30 = arith.truncf %29 : vector<2x64xf32> to vector<2x64xbf16>
      %c0_24 = arith.constant 0 : index
      %c0_25 = arith.constant 0 : index
      %31 = vector.load %arg7[%c0_24, %c0_25] : memref<64x128xbf16, #tpu.memory_space<vmem>>, vector<64x128xbf16>
      %cst_26 = arith.constant dense<0.000000e+00> : vector<2x128xf32>
      %32 = tpu.matmul %30, %31, %cst_26 {dimension_numbers = #tpu.dot_dimension_numbers<[1], [0], [0], [1], [0, 0, 1, 1], [], []>} : vector<2x64xbf16>, vector<64x128xbf16>, vector<2x128xf32> -> vector<2x128xf32>
      %cst_27 = arith.constant 9.99999993E-9 : f32
      %cst_28 = arith.constant 9.99999993E-9 : f32
      %33 = arith.mulf %cst_27, %cst_28 : f32
      %34 = arith.mulf %27, %27 : vector<2x128xf32>
      %cst_29 = arith.constant dense<0.000000e+00> : vector<2xf32>
      %35 = vector.multi_reduction <add>, %34, %cst_29 [1] : vector<2x128xf32> to vector<2xf32>
      %36 = vector.shape_cast %35 : vector<2xf32> to vector<2x1xf32>
      %37 = arith.mulf %32, %32 : vector<2x128xf32>
      %cst_30 = arith.constant dense<0.000000e+00> : vector<2xf32>
      %38 = vector.multi_reduction <add>, %37, %cst_30 [1] : vector<2x128xf32> to vector<2xf32>
      %39 = vector.shape_cast %38 : vector<2xf32> to vector<2x1xf32>
      %40 = arith.mulf %28, %28 : vector<2x128xf32>
      %cst_31 = arith.constant dense<0.000000e+00> : vector<2xf32>
      %41 = vector.multi_reduction <add>, %40, %cst_31 [1] : vector<2x128xf32> to vector<2xf32>
      %42 = vector.shape_cast %41 : vector<2xf32> to vector<2x1xf32>
      %43 = arith.mulf %27, %32 : vector<2x128xf32>
      %cst_32 = arith.constant dense<0.000000e+00> : vector<2xf32>
      %44 = vector.multi_reduction <add>, %43, %cst_32 [1] : vector<2x128xf32> to vector<2xf32>
      %45 = vector.shape_cast %44 : vector<2xf32> to vector<2x1xf32>
      %46 = arith.mulf %27, %28 : vector<2x128xf32>
      %cst_33 = arith.constant dense<0.000000e+00> : vector<2xf32>
      %47 = vector.multi_reduction <add>, %46, %cst_33 [1] : vector<2x128xf32> to vector<2xf32>
      %48 = vector.shape_cast %47 : vector<2xf32> to vector<2x1xf32>
      %49 = arith.mulf %36, %39 : vector<2x1xf32>
      %50 = vector.broadcast %33 : f32 to vector<2x1xf32>
      %51 = arith.maximumf %49, %50 : vector<2x1xf32>
      %52 = math.rsqrt %51 : vector<2x1xf32>
      %53 = arith.mulf %45, %52 : vector<2x1xf32>
      %54 = arith.mulf %36, %42 : vector<2x1xf32>
      %55 = vector.broadcast %33 : f32 to vector<2x1xf32>
      %56 = arith.maximumf %54, %55 : vector<2x1xf32>
      %57 = math.rsqrt %56 : vector<2x1xf32>
      %58 = arith.mulf %48, %57 : vector<2x1xf32>
      %cst_34 = arith.constant 1.000000e+00 : f32
      %59 = vector.broadcast %cst_34 : f32 to vector<2x1xf32>
      %60 = arith.mulf %59, %25 : vector<2x1xf32>
      %cst_35 = arith.constant 2.000000e+00 : f32
      %61 = vector.broadcast %cst_35 : f32 to vector<2x1xf32>
      %62 = arith.subf %61, %53 : vector<2x1xf32>
      %63 = arith.subf %62, %58 : vector<2x1xf32>
      %cst_36 = arith.constant 1.000000e+00 : f32
      %64 = vector.broadcast %cst_36 : f32 to vector<2x1xf32>
      %65 = arith.mulf %64, %63 : vector<2x1xf32>
      %66 = arith.addf %60, %65 : vector<2x1xf32>
      %67 = vector.shape_cast %66 : vector<2x1xf32> to vector<2x1xf32>
      %68 = vector.broadcast %67 : vector<2x1xf32> to vector<2x128xf32>
      %c0_37 = arith.constant 0 : index
      %c0_38 = arith.constant 0 : index
      %69 = vector.load %arg8[%c0_37, %c0_38] : memref<2x128xf32, #tpu.memory_space<vmem>>, vector<2x128xf32>
      tpu.vector_store %arg8[%c0_37, %c0_38], %68 {strides = array<i32>} : memref<2x128xf32, #tpu.memory_space<vmem>>, vector<2x128xf32>,
    } else {
    }
    return
  }
  func.func @transform_0(%arg0: i32) -> (i32, i32) {
    %c0_i32 = arith.constant 0 : i32
    %c0_i32_0 = arith.constant 0 : i32
    %c0_i32_1 = arith.constant 0 : i32
    return %c0_i32, %c0_i32_0 : i32, i32
  }
  func.func @transform_1(%arg0: i32) -> (i32, i32) {
    %c0_i32 = arith.constant 0 : i32
    %c0_i32_0 = arith.constant 0 : i32
    %c0_i32_1 = arith.constant 0 : i32
    return %c0_i32, %c0_i32_0 : i32, i32
  }
  func.func @transform_2(%arg0: i32) -> (i32, i32) {
    %c0_i32 = arith.constant 0 : i32
    %c0_i32_0 = arith.constant 0 : i32
    return %c0_i32, %arg0 : i32, i32
  }
  func.func @transform_3(%arg0: i32) -> (i32, i32) {
    %c0_i32 = arith.constant 0 : i32
    %c0_i32_0 = arith.constant 0 : i32
    %c0_i32_1 = arith.constant 0 : i32
    return %c0_i32, %c0_i32_0 : i32, i32
  }
  func.func @transform_4(%arg0: i32) -> (i32, i32) {
    %c0_i32 = arith.constant 0 : i32
    %c0_i32_0 = arith.constant 0 : i32
    return %c0_i32, %arg0 : i32, i32
  }
  func.func @transform_5(%arg0: i32) -> (i32, i32) {
    %c0_i32 = arith.constant 0 : i32
    %c0_i32_0 = arith.constant 0 : i32
    return %arg0, %c0_i32 : i32, i32
  }
  func.func @transform_6(%arg0: i32) -> (i32, i32) {
    %c0_i32 = arith.constant 0 : i32
    %c0_i32_0 = arith.constant 0 : i32
    %c0_i32_1 = arith.constant 0 : i32
    return %c0_i32, %c0_i32_0 : i32, i32
  }
  func.func @transform_7(%arg0: i32) -> (i32, i32) {
    %c0_i32 = arith.constant 0 : i32
    %c0_i32_0 = arith.constant 0 : i32
    %c0_i32_1 = arith.constant 0 : i32
    return %c0_i32, %c0_i32_0 : i32, i32
  }
}

</mosaic_0001>

<bundles_post_ra>
// kernel: clap_loss_forward.1
= control target key start
LH: loop header
LB: loop body
LE: loop exit
PB: predicated region body
PF: predicated region fallthrough
CT: control target
= control target key end

     0   :  { %s4767_s0 = inlined_call_operand.vmem [shape: f32[2,1024], index: 0, kind: input, shape index: {}]   ;;  %s4768_s1 = inlined_call_operand.vmem [shape: f32[2,1024], index: 1, kind: input, shape index: {}]   ;;  %s4769_s2 = inlined_call_operand.hbm [shape: f32[2,1024], index: 2, kind: input, shape index: {}]   ;;  %s4770_s3 = inlined_call_operand.hbm [shape: f32[2,64], index: 3, kind: input, shape index: {}]   ;;  %s4771_s4 = inlined_call_operand.hbm [shape: bf16[1024,1024], index: 4, kind: input, shape index: {}]   ;;  %s4772_s5 = inlined_call_operand.hbm [shape: bf16[1024,128], index: 5, kind: input, shape index: {}]   ;;  %s4773_s6 = inlined_call_operand.hbm [shape: bf16[64,128], index: 6, kind: input, shape index: {}]   ;;  %s4774_s7 = inlined_call_operand.vmem [shape: f32[2,128], index: 7, kind: output, shape index: {}]  }
   0x1   :  { %4782 = sst [smem:[#allocation15_spill]] %s4769_s2 }
   0x2   :  { %4783 = sst [smem:[#allocation16_spill]] %s4771_s4 }
   0x3   :  { %12 = vsyncpa [#allocation4], 0 }
   0x4   :  { %14 = vsyncpa [#allocation4 + $0x1], 0 }
   0x5   :  { %15 = vsyncpa [#allocation6], 0  ;;  %s4138_s24 = smov 0   ;;  %s4140_s25 = smov 0  }
   0x6   :  { %s4142_s26 = smov 0   ;;  %s4144_s27 = smov 0  }
   0x7 LB: > { %s4159_s28 = sadd.s32 1, %s4081_s27   ;;  %s70_s29 = sadd.s32 1, %s4077_s26  ;;  %s4081_s27 = sphi %s4144_s27, %s4806_s27   ;;  %s4077_s26 = sphi %s4142_s26, %s4805_s26   ;;  %s4073_s25 = sphi %s4140_s25, %s4804_s25   ;;  %s4069_s24 = sphi %s4138_s24, %s4803_s24  }
   0x8   : > { %s67_s30 = ssub.s32 %s4081_s27, %s4159_s28  ;;  %p77_p0 = scmp.ne.s32.totalorder %s4077_s26, %s4073_s25 }
   0x9   : > { %p68_p1 = scmp.eq.s32.totalorder %s67_s30, 0  ;;  %p78_p2 = scmp.eq.s32.totalorder %s4081_s27, 0 }
   0xa   : > { %p3414_p3 = scmp.lt.s32.totalorder %s4081_s27, 2  ;;  %s252_s9 = sand.u32 1, %s4081_s27  }
   0xb   : > { %s4169_s8 = scalar_select %p68_p1, %s4077_s26, %s70_s29  }
   0xc   : > { %p79_p4 = por %p78_p2, %p77_p0  ;;  %s4173_s10 = sand.u32 1, %s4077_s26  }
   0xd   : > { %4784 = sst [smem:[#allocation14_spill]] %s4169_s8  ;;  %s2981_s11 = sshll.u32 %s4173_s10, 3 }
   0xe   : > { %s3293_s12 = sshll.u32 %s4081_s27, 7  ;;  %s4785_s2 = sld [smem:[#allocation15_spill]] }
   0xf   : > { %s256_s16 = scalar_lea.vmem [#allocation3], %s2981_s11  ;;  %p4182_p5 = pnand %p3414_p3, %p79_p4 }
  0x10   : > { %s264_s17 = sshll.u32 %s256_s16, 4  ;;  %s2984_s19 = sshll.u32 %s4173_s10, 11  ;;  %s4186_s17 = int_to_ptr.vmem [resolvable:$true] %s264_s17 }
  0x11   : > { %s4786_s18 = scalar_select %p4182_p5, 1, 0 }
  0x12   : > { %s4189_s20 = scalar_lea.sflag [#allocation4], %s252_s9  ;;  %p4195_p7 = pneg %p4182_p5 }
  0x14   : > { %s4180_s15 = scalar_lea.hbm %s4785_s2, %s3293_s12  ;;  %s3894_s30 = scalar_lea.hbm %s4785_s2, 256 }
  0x15   : > { %s3889_s21 = scalar_lea.hbm %s4180_s15, 128  ;;  %p3895_p10 = scmp.lt.u32.totalorder %s4180_s15, %s4785_s2 }
  0x16   : > { %p3890_p6 = scmp.ne.s32.totalorder %s4180_s15, %s3889_s21  ;;  %p3896_p11 = scmp.lt.u32.totalorder %s3894_s30, %s3889_s21 }
  0x17   : > { %s4787_s22 = scalar_select %p4195_p7, 1, 0 }
  0x18   : > { %p3892_p8 = pnand %p4195_p7, %p3890_p6  ;;  %p3897_p12 = por %p3896_p11, %p3895_p10 }
  0x19   : > { %p3898_p13 = scmp.lt.u32.totalorder %s3889_s21, %s4180_s15 }
  0x1a   : > { %p3893_p9 = pneg %p3892_p8 }
  0x1b   : > { %p3899_p0 = por %p3898_p13, %p3897_p12 }
  0x1d   : > { %p3900_p1 = pnand %p3899_p0, %p3893_p9 }
  0x1f   : > { %3903 = shalt.err (!%p3900_p1)
}
  0x20   : > { %s3904_s9 = scalar_lea.vmem %s4186_s17, 128  ;;  %s4083_s13 = smov [#allocation3]  }
  0x21   : > { %p3905_p2 = scmp.ne.s32.totalorder %s4186_s17, %s3904_s9  ;;  %s3909_s14 = sshll.u32 %s4083_s13, 4  ;;  %s3910_s14 = int_to_ptr.vmem [resolvable:$false] %s3909_s14 }
  0x22   : > { %s3911_s16 = scalar_lea.vmem %s3910_s14, 256  ;;  %p3912_p6 = scmp.lt.s32.totalorder %s4186_s17, %s3910_s14 }
  0x23   : > { %p3907_p3 = pnand %p3905_p2, %p4195_p7  ;;  %p3913_p8 = scmp.lt.s32.totalorder %s3911_s16, %s3904_s9 }
  0x25   : > { %p3908_p4 = pneg %p3907_p3  ;;  %p3914_p10 = por %p3913_p8, %p3912_p6 }
  0x27   : > { %p3915_p11 = pnand %p3914_p10, %p3908_p4 }
  0x29   : > { %3918 = shalt.err (!%p3915_p11)
}
  0x2a   : > { %3405 = dma.hbm_to_vmem [thread:$0]  (!%p4182_p5), %s4180_s15, 128, %s4186_s17, %s4189_s20  }
  0x2b   : > { %s275_s21 = scalar_lea.vmem [#allocation7], %s2984_s19  ;;  %s2987_s29 = sshll.u32 %s4173_s10, 8 }
  0x2c   : > { %s282_s23 = sshll.u32 %s275_s21, 4  ;;  %s296_s30 = scalar_lea.vmem [#allocation8], %s2987_s29  ;;  %s4222_s23 = int_to_ptr.vmem [resolvable:$true] %s282_s23 }
  0x2d   : > { %s303_s11 = sshll.u32 %s296_s30, 4  ;;  %s4227_s12 = sadd.s32 4294967295, %s4081_s27   ;;  %s4224_s11 = int_to_ptr.vmem [resolvable:$true] %s303_s11 }
  0x2e   : > { %p83_p9 = scmp.ne.s32.totalorder %s4073_s25, %s4069_s24  ;;  %p4775_p12 = scmp.eq.s32.totalorder %s4227_s12, 0 }
  0x2f   : > { %p2977_p13 = scmp.ge.s32.totalorder %s4081_s27, 1  ;;  %p209_p0 = scmp.lt.s32.totalorder %s4081_s27, 3 }
  0x30   : > { %p4237_p2 = por %p4775_p12, %p83_p9  ;;  %s4084_s17 = smov [#allocation5]  }
  0x31   : > { %p4241_p3 = pnand %p2977_p13, %p209_p0  ;;  %s228_s19 = sshll.u32 %s4084_s17, 4  ;;  %s4245_s19 = int_to_ptr.vmem [resolvable:$true] %s228_s19 }
  0x32   : > { %s4788_s10 = scalar_select %p4237_p2, 1, 0 }
  0x33   : > { %s4789_s15 = scalar_select %p4241_p3, 1, 0 }
  0x34   : > { %s3294_s24 = sshll.u32 %s4081_s27, 8  ;;  %p3395_p4 = pneg %p4241_p3 }
  0x35   : > { %s4790_s4 = sld [smem:[#allocation16_spill]] }
  0x36   : > { %p4257_p6 = pnand %p3395_p4, %p4775_p12 }
  0x38   : > { %s4791_s16 = scalar_select %p4257_p6, 1, 0 }
  0x3b   : > { %s4253_s14 = scalar_lea.hbm %s4790_s4, %s3294_s24  ;;  %s3924_s17 = scalar_lea.hbm %s4790_s4, 65536 }
  0x3c   : > { %s3919_s21 = scalar_lea.hbm %s4253_s14, 32768  ;;  %p3925_p9 = scmp.lt.u32.totalorder %s4253_s14, %s4790_s4 }
  0x3d   : > { %p3920_p8 = scmp.ne.s32.totalorder %s4253_s14, %s3919_s21  ;;  %p3926_p13 = scmp.lt.u32.totalorder %s3924_s17, %s3919_s21 }
  0x3e   : > { %p3928_p1 = scmp.lt.u32.totalorder %s3919_s21, %s4253_s14 }
  0x3f   : > { %p3922_p10 = pnand %p3920_p8, %p4195_p7  ;;  %p3927_p0 = por %p3926_p13, %p3925_p9 }
  0x41   : > { %p3923_p11 = pneg %p3922_p10  ;;  %p3929_p4 = por %p3928_p1, %p3927_p0 }
  0x43   : > { %p3930_p12 = pnand %p3929_p4, %p3923_p11 }
  0x45   : > { %3933 = shalt.err (!%p3930_p12)
}
  0x46   : > { %s3934_s13 = scalar_lea.vmem %s4222_s23, 32768  ;;  %s4085_s29 = smov [#allocation7]  }
  0x47   : > { %p3935_p8 = scmp.ne.s32.totalorder %s4222_s23, %s3934_s13  ;;  %s3939_s30 = sshll.u32 %s4085_s29, 4  ;;  %s3940_s30 = int_to_ptr.vmem [resolvable:$false] %s3939_s30 }
  0x48   : > { %s3941_s24 = scalar_lea.vmem %s3940_s30, 65536  ;;  %p3942_p3 = scmp.lt.s32.totalorder %s4222_s23, %s3940_s30 }
  0x49   : > { %p3937_p10 = pnand %p3935_p8, %p4195_p7  ;;  %p3943_p6 = scmp.lt.s32.totalorder %s3941_s24, %s3934_s13 }
  0x4b   : > { %p3938_p2 = pneg %p3937_p10  ;;  %p3944_p9 = por %p3943_p6, %p3942_p3 }
  0x4d   : > { %p3945_p13 = pnand %p3944_p9, %p3938_p2 }
  0x4f   : > { %3948 = shalt.err (!%p3945_p13)
}
  0x50   : > { %s4086_s21 = smov 512   ;;  %s4087_s17 = smov 256  }
  0x51   : > { %s4088_s9 = smov 16   ;;  %s3949_s4 = scalar_lea.hbm %s4770_s3, 32 }
  0x52   : > { %3408 = dma.hbm_to_vmem [thread:$0]  (!%p4182_p5), %s4253_s14, 32768, %s4222_s23, %s4189_s20, %s4086_s21, %s4087_s17, %s4088_s9  }
  0x53   : > { %p3950_p12 = scmp.ne.s32.totalorder %s4770_s3, %s3949_s4  ;;  %p4792_p1 = scmp.ne.s32.totalorder %s4791_s16, 0 }
  0x54   : > { %p3956_p11 = scmp.lt.u32.totalorder %s3949_s4, %s4770_s3 }
  0x55   : > { %p3951_p2 = pneg %p4792_p1 }
  0x57   : > { %p3952_p3 = pnand %p3951_p2, %p3950_p12 }
  0x59   : > { %p3953_p6 = pneg %p3952_p3 }
  0x5b   : > { %p3958_p0 = pnand %p3956_p11, %p3953_p6 }
  0x5d   : > { %3961 = shalt.err (!%p3958_p0)
}
  0x5e   : > { %s3962_s2 = scalar_lea.vmem %s4245_s19, 32  ;;  %p3970_p9 = scmp.lt.s32.totalorder %s4245_s19, %s4245_s19 }
  0x5f   : > { %p3963_p4 = scmp.ne.s32.totalorder %s4245_s19, %s3962_s2  ;;  %p3971_p13 = scmp.lt.s32.totalorder %s3962_s2, %s3962_s2 }
  0x61   : > { %p3965_p8 = pnand %p3963_p4, %p3951_p2  ;;  %p3972_p12 = por %p3971_p13, %p3970_p9 }
  0x63   : > { %p3966_p10 = pneg %p3965_p8 }
  0x65   : > { %p3973_p3 = pnand %p3972_p12, %p3966_p10 }
  0x67   : > { %3976 = shalt.err (!%p3973_p3)
}
  0x68   : > { %3398 = dma.hbm_to_vmem [thread:$0]  (!%p4792_p1), %s4770_s3, 32, %s4245_s19, [#allocation6]  }
  0x69   : > { %s4089_s23 = smov [#allocation9]   ;;  %s3977_s9 = scalar_lea.hbm %s4773_s6, 512 }
  0x6a   : > { %s238_s14 = sshll.u32 %s4089_s23, 4  ;;  %p3978_p6 = scmp.ne.s32.totalorder %s4773_s6, %s3977_s9  ;;  %s239_s14 = int_to_ptr.vmem [resolvable:$true] %s238_s14 }
  0x6b   : > { %p3984_p4 = scmp.lt.u32.totalorder %s3977_s9, %s4773_s6 }
  0x6c   : > { %p3980_p11 = pnand %p3978_p6, %p3951_p2 }
  0x6e   : > { %p3981_p0 = pneg %p3980_p11 }
  0x70   : > { %p3986_p8 = pnand %p3984_p4, %p3981_p0 }
  0x72   : > { %3989 = shalt.err (!%p3986_p8)
}
  0x73   : > { %s3990_s19 = scalar_lea.vmem %s239_s14, 512  ;;  %p3998_p12 = scmp.lt.s32.totalorder %s239_s14, %s239_s14 }
  0x74   : > { %p3991_p10 = scmp.ne.s32.totalorder %s239_s14, %s3990_s19  ;;  %p3999_p3 = scmp.lt.s32.totalorder %s3990_s19, %s3990_s19 }
  0x76   : > { %p3993_p9 = pnand %p3991_p10, %p3951_p2  ;;  %p4000_p5 = por %p3999_p3, %p3998_p12 }
  0x78   : > { %p3994_p13 = pneg %p3993_p9 }
  0x7a   : > { %p4001_p7 = pnand %p4000_p5, %p3994_p13 }
  0x7c   : > { %4004 = shalt.err (!%p4001_p7)
}
  0x7d   : > { %s4090_s2 = smov 64   ;;  %s4091_s4 = smov 4  }
  0x7e   : > { %3401 = dma.hbm_to_vmem [thread:$0]  (!%p4792_p1), %s4773_s6, 512, %s239_s14, [#allocation6], %s4090_s2, %s4090_s2, %s4091_s4  }
  0x7f   : > { %s3295_s21 = sshll.u32 %s4081_s27, 12  ;;  %p4793_p7 = scmp.ne.s32.totalorder %s4787_s22, 0 }
  0x80   : > { %s4337_s29 = scalar_lea.hbm %s4772_s5, %s3295_s21  ;;  %s4010_s24 = scalar_lea.hbm %s4772_s5, 8192 }
  0x81   : > { %s4005_s30 = scalar_lea.hbm %s4337_s29, 4096  ;;  %p4011_p1 = scmp.lt.u32.totalorder %s4337_s29, %s4772_s5 }
  0x82   : > { %p4006_p5 = scmp.ne.s32.totalorder %s4337_s29, %s4005_s30  ;;  %p4012_p11 = scmp.lt.u32.totalorder %s4010_s24, %s4005_s30 }
  0x83   : > { %p4014_p4 = scmp.lt.u32.totalorder %s4005_s30, %s4337_s29 }
  0x84   : > { %p4008_p2 = pnand %p4006_p5, %p4793_p7  ;;  %p4013_p0 = por %p4012_p11, %p4011_p1 }
  0x86   : > { %p4009_p6 = pneg %p4008_p2  ;;  %p4015_p8 = por %p4014_p4, %p4013_p0 }
  0x88   : > { %p4016_p10 = pnand %p4015_p8, %p4009_p6 }
  0x8a   : > { %4019 = shalt.err (!%p4016_p10)
}
  0x8b   : > { %s4020_s19 = scalar_lea.vmem %s4224_s11, 4096  ;;  %s4092_s8 = smov [#allocation8]  }
  0x8c   : > { %p4021_p9 = scmp.ne.s32.totalorder %s4224_s11, %s4020_s19  ;;  %s4025_s23 = sshll.u32 %s4092_s8, 4  ;;  %s4026_s23 = int_to_ptr.vmem [resolvable:$false] %s4025_s23 }
  0x8d   : > { %s4027_s21 = scalar_lea.vmem %s4026_s23, 8192  ;;  %p4028_p3 = scmp.lt.s32.totalorder %s4224_s11, %s4026_s23 }
  0x8e   : > { %p4023_p13 = pnand %p4021_p9, %p4793_p7  ;;  %p4029_p5 = scmp.lt.s32.totalorder %s4027_s21, %s4020_s19 }
  0x90   : > { %p4024_p12 = pneg %p4023_p13  ;;  %p4030_p2 = por %p4029_p5, %p4028_p3 }
  0x92   : > { %p4031_p1 = pnand %p4030_p2, %p4024_p12 }
  0x94   : > { %4034 = shalt.err (!%p4031_p1)
}
  0x95   : > { %p4794_p6 = scmp.ne.s32.totalorder %s4786_s18, 0  ;;  %p4795_p7 = scmp.ne.s32.totalorder %s4789_s15, 0 }
  0x96   : > { %s317_s22 = sand.u32 (!%p4795_p7), 1, %s4227_s12   ;;  %s319_s17 = sand.u32 (!%p4795_p7), 1, %s4073_s25  }
  0x97   : > { %3411 = dma.hbm_to_vmem [thread:$0]  (!%p4794_p6), %s4337_s29, 4096, %s4224_s11, %s4189_s20, %s4090_s2, %s4090_s2, %s4091_s4  }
  0x98   : > { %315 = sbr.rel (%p4795_p7) target bundleno = 1180 (0x49c), region = 48  ;;  %s2991_s9 = sshll.u32 (!%p4795_p7), %s319_s17, 3 }
  0x99   : > { %s318_s30 = scalar_lea.sflag (!%p4795_p7), [#allocation4], %s317_s22  ;;  %s4368_s16 = scalar_lea.vmem (!%p4795_p7), [#allocation3], %s2991_s9 }
  0x9a   : > { %p4796_p11 = scmp.ne.s32.totalorder (!%p4795_p7), %s4788_s10, 0 }
  0x9f   : > { %4052 = dma.done.wait (%p4796_p11), %s318_s30, 128  }
  0xa0   : > { %4054 = vsyncadd (%p4796_p11), %s318_s30, 4294967168  ;;  %p4797_p0 = scmp.eq.s32.totalorder %s4227_s12, 0 }
  0xa2   : > { %4056 = dma.done.wait (%p4797_p0), [#allocation6], 32   ;;  %p4798_p4 = pmov %p4797_p0 }
  0xa3   : > { %s2993_s18 = sshll.u32 %s319_s17, 11 }
  0xa4   : > { %4058 = vsyncadd (%p4798_p4), [#allocation6], 4294967264  ;;  %s4378_s20 = scalar_lea.vmem [#allocation7], %s2993_s18 }
  0xa5   : > { %4060 = dma.done.wait (%p4796_p11), %s318_s30, 36864  }
  0xa6   : > { %4062 = vsyncadd (%p4796_p11), %s318_s30, 4294930432  ;;  %s2994_s11 = sshll.u32 %s319_s17, 8  ;;  %p4799_p8 = pmov %p4797_p0 }
  0xa7   : > { %s4384_s15 = scalar_lea.vmem [#allocation8], %s2994_s11 }
  0xa8   : > { %4064 = dma.done.wait (%p4799_p8), [#allocation6], 512   ;;  %p4800_p10 = pmov %p4797_p0 }
  0xa9   : > { %p4801_p9 = scmp.ne.s32.totalorder %s4227_s12, 0 }
  0xaa   : > { %4066 = vsyncadd (%p4800_p10), [#allocation6], 4294966784  ;;  %v4093_v0 = vmov (!%p4801_p9), 0.0  }
  0xab   : > { %390 = sbr.rel (%p4801_p9) target bundleno = 178 (0xb2), region = 72  ;;  %391 = vst [vmem:[#allocation2] sm:$0xf] (!%p4801_p9), %v4093_v0 }
  0xb2 PF: > { %v3461_v1 = vld [vmem:[%s4378_s20 + $0x4] ss:$16 sps:$4 sm:$0xff]   ;;  %v3463_v2 = vld [vmem:[%s4378_s20 + $0xc] ss:$16 sps:$4 sm:$0xff]   ;;  %v3465_v3 = vld [vmem:[%s4378_s20] ss:$16 sps:$4 sm:$0xff]   ;;  %v400_v39 = vlaneseq }
  0xb3   : > { %1982 = vmatprep.subr.bf16.mxu0 %v3461_v1  ;;  %v3466_v4 = vld [vmem:[%s4378_s20 + $0x8] ss:$16 sps:$4 sm:$0xff]   ;;  %2146 = vmatprep.subr.bf16.mxu1 %v3463_v2  ;;  %v3467_v5 = vld [vmem:[%s4378_s20 + $0x24] ss:$16 sps:$4 sm:$0xff]   ;;  %v3469_v6 = vld [vmem:[%s4378_s20 + $0x2c] ss:$16 sps:$4 sm:$0xff]  }
  0xb4   : > { %1983 = vmatpush1.bf16.msra.mxu0 %v3465_v3  ;;  %2147 = vmatpush1.bf16.msra.mxu1 %v3466_v4  ;;  %v3471_v7 = vld [vmem:[%s4378_s20 + $0x20] ss:$16 sps:$4 sm:$0xff]   ;;  %v3472_v8 = vld [vmem:[%s4378_s20 + $0x28] ss:$16 sps:$4 sm:$0xff]   ;;  %v3473_v9 = vld [vmem:[%s4378_s20 + $0x44] ss:$16 sps:$4 sm:$0xff]  }
  0xb5   : > { %1984 = vmatprep.subr.bf16.mxu0 %v3467_v5  ;;  %2148 = vmatprep.subr.bf16.mxu1 %v3469_v6  ;;  %v3475_v10 = vld [vmem:[%s4378_s20 + $0x4c] ss:$16 sps:$4 sm:$0xff]   ;;  %v3477_v11 = vld [vmem:[%s4378_s20 + $0x40] ss:$16 sps:$4 sm:$0xff]   ;;  %v3478_v12 = vld [vmem:[%s4378_s20 + $0x48] ss:$16 sps:$4 sm:$0xff]  }
  0xb6   : > { %v3479_v13 = vld [vmem:[%s4378_s20 + $0x64] ss:$16 sps:$4 sm:$0xff]   ;;  %v3481_v14 = vld [vmem:[%s4378_s20 + $0x6c] ss:$16 sps:$4 sm:$0xff]   ;;  %v3483_v15 = vld [vmem:[%s4378_s20 + $0x60] ss:$16 sps:$4 sm:$0xff]  }
  0xb7   : > { %v3484_v16 = vld [vmem:[%s4378_s20 + $0x68] ss:$16 sps:$4 sm:$0xff]   ;;  %v3485_v17 = vld [vmem:[%s4378_s20 + $0x84] ss:$16 sps:$4 sm:$0xff]   ;;  %v3487_v18 = vld [vmem:[%s4378_s20 + $0x8c] ss:$16 sps:$4 sm:$0xff]  }
  0xb8   : > { %1985 = vmatpush1.bf16.msra.mxu0 %v3471_v7  ;;  %2149 = vmatpush1.bf16.msra.mxu1 %v3472_v8  ;;  %v3489_v19 = vld [vmem:[%s4378_s20 + $0x80] ss:$16 sps:$4 sm:$0xff]   ;;  %v3490_v20 = vld [vmem:[%s4378_s20 + $0x88] ss:$16 sps:$4 sm:$0xff]   ;;  %v3491_v21 = vld [vmem:[%s4378_s20 + $0xa4] ss:$16 sps:$4 sm:$0xff]  }
  0xb9   : > { %1986 = vmatprep.subr.bf16.mxu0 %v3473_v9  ;;  %2150 = vmatprep.subr.bf16.mxu1 %v3475_v10  ;;  %v3493_v22 = vld [vmem:[%s4378_s20 + $0xac] ss:$16 sps:$4 sm:$0xff]   ;;  %v3495_v23 = vld [vmem:[%s4378_s20 + $0xa0] ss:$16 sps:$4 sm:$0xff]   ;;  %v3496_v24 = vld [vmem:[%s4378_s20 + $0xa8] ss:$16 sps:$4 sm:$0xff]  }
  0xba   : > { %v3497_v25 = vld [vmem:[%s4378_s20 + $0xc4] ss:$16 sps:$4 sm:$0xff]   ;;  %v3499_v26 = vld [vmem:[%s4378_s20 + $0xcc] ss:$16 sps:$4 sm:$0xff]   ;;  %v3501_v27 = vld [vmem:[%s4378_s20 + $0xc0] ss:$16 sps:$4 sm:$0xff]  }
  0xbb   : > { %v3502_v28 = vld [vmem:[%s4378_s20 + $0xc8] ss:$16 sps:$4 sm:$0xff]   ;;  %v3503_v29 = vld [vmem:[%s4378_s20 + $0xe4] ss:$16 sps:$4 sm:$0xff]   ;;  %v3505_v30 = vld [vmem:[%s4378_s20 + $0xec] ss:$16 sps:$4 sm:$0xff]  }
  0xbc   : > { %1987 = vmatpush1.bf16.msra.mxu0 %v3477_v11  ;;  %2151 = vmatpush1.bf16.msra.mxu1 %v3478_v12  ;;  %v3507_v31 = vld [vmem:[%s4378_s20 + $0xe0] ss:$16 sps:$4 sm:$0xff]   ;;  %v3508_v32 = vld [vmem:[%s4378_s20 + $0xe8] ss:$16 sps:$4 sm:$0xff]   ;;  %v3509_v33 = vld [vmem:[%s4378_s20 + $0x104] ss:$16 sps:$4 sm:$0xff]  }
  0xbd   : > { %1988 = vmatprep.subr.bf16.mxu0 %v3479_v13  ;;  %2152 = vmatprep.subr.bf16.mxu1 %v3481_v14  ;;  %v3511_v34 = vld [vmem:[%s4378_s20 + $0x10c] ss:$16 sps:$4 sm:$0xff]   ;;  %v3513_v35 = vld [vmem:[%s4378_s20 + $0x100] ss:$16 sps:$4 sm:$0xff]   ;;  %v3514_v36 = vld [vmem:[%s4378_s20 + $0x108] ss:$16 sps:$4 sm:$0xff]  }
  0xbe   : > { %v4094_v37 = vmov 1983009808   ;;  %v3515_v40 = vld [vmem:[%s4378_s20 + $0x124] ss:$16 sps:$4 sm:$0xff]   ;;  %v3517_v41 = vld [vmem:[%s4378_s20 + $0x12c] ss:$16 sps:$4 sm:$0xff]  }
  0xbf   : > { %v398_v38 = vunpack.c.l.s4 %v4094_v37  ;;  %v3519_v42 = vld [vmem:[%s4378_s20 + $0x120] ss:$16 sps:$4 sm:$0xff]   ;;  %v401_v44 = vshrl.u32 %v400_v39, 7  ;;  %v3520_v45 = vld [vmem:[%s4378_s20 + $0x128] ss:$16 sps:$4 sm:$0xff]   ;;  %vm2333_vm0 = vcmask 1041408  }
  0xc0   : > { %1989 = vmatpush1.bf16.msra.mxu0 %v3483_v15  ;;  %2153 = vmatpush1.bf16.msra.mxu1 %v3484_v16  ;;  %v3521_v46 = vld [vmem:[%s4378_s20 + $0x144] ss:$16 sps:$4 sm:$0xff]   ;;  %v3523_v47 = vld [vmem:[%s4378_s20 + $0x14c] ss:$16 sps:$4 sm:$0xff]   ;;  %v3525_v48 = vld [vmem:[%s4378_s20 + $0x140] ss:$16 sps:$4 sm:$0xff]  }
  0xc1   : > { %1990 = vmatprep.subr.bf16.mxu0 %v3485_v17  ;;  %2154 = vmatprep.subr.bf16.mxu1 %v3487_v18  ;;  %v399_v43 = vunpack.c.0.s8 %v398_v38  ;;  %v3526_v49 = vld [vmem:[%s4378_s20 + $0x148] ss:$16 sps:$4 sm:$0xff]   ;;  %v3527_v51 = vld [vmem:[%s4378_s20 + $0x164] ss:$16 sps:$4 sm:$0xff]   ;;  %v3529_v52 = vld [vmem:[%s4378_s20 + $0x16c] ss:$16 sps:$4 sm:$0xff]  }
  0xc2   : > { %v392_v53 = vld [vmem:[%s4767_s0] sm:$0xff]  ;;  %v3533_v57 = vld [vmem:[%s4378_s20 + $0x184] ss:$16 sps:$4 sm:$0xff]   ;;  %p3285_p13 = scmp.ne.s32.totalorder %s4227_s12, 1 }
  0xc3   : > { %v4436_v50 = vsub.s32 %v399_v43, %v401_v44  ;;  %v3531_v54 = vld [vmem:[%s4378_s20 + $0x160] ss:$16 sps:$4 sm:$0xff]   ;;  %v3532_v56 = vld [vmem:[%s4378_s20 + $0x168] ss:$16 sps:$4 sm:$0xff]   ;;  %v3535_v58 = vld [vmem:[%s4378_s20 + $0x18c] ss:$16 sps:$4 sm:$0xff]   ;;  %v396_v5 = vcombine.high %v392_v53, %v392_v53 }
  0xc4   : > { %1991 = vmatpush1.bf16.msra.mxu0 %v3489_v19  ;;  %2155 = vmatpush1.bf16.msra.mxu1 %v3490_v20  ;;  %v3537_v60 = vld [vmem:[%s4378_s20 + $0x180] ss:$16 sps:$4 sm:$0xff]   ;;  %v3538_v62 = vld [vmem:[%s4378_s20 + $0x188] ss:$16 sps:$4 sm:$0xff]   ;;  %v3539_v63 = vld [vmem:[%s4378_s20 + $0x1a4] ss:$16 sps:$4 sm:$0xff]  }
  0xc5   : > { %1992 = vmatprep.subr.bf16.mxu0 %v3491_v21  ;;  %2156 = vmatprep.subr.bf16.mxu1 %v3493_v22  ;;  %v403_v55 = vrot.slane %v392_v53, %v4436_v50  ;;  %v3541_v0 = vld [vmem:[%s4378_s20 + $0x1ac] ss:$16 sps:$4 sm:$0xff]   ;;  %v3543_v1 = vld [vmem:[%s4378_s20 + $0x1a0] ss:$16 sps:$4 sm:$0xff]   ;;  %v3544_v2 = vld [vmem:[%s4378_s20 + $0x1a8] ss:$16 sps:$4 sm:$0xff]   ;;  %v4461_v10 = vrot.slane %v396_v5, %v4436_v50 }
  0xc6   : > { %v3545_v3 = vld [vmem:[%s4378_s20 + $0x1c4] ss:$16 sps:$4 sm:$0xff]   ;;  %v3547_v4 = vld [vmem:[%s4378_s20 + $0x1cc] ss:$16 sps:$4 sm:$0xff]   ;;  %v3549_v6 = vld [vmem:[%s4378_s20 + $0x1c0] ss:$16 sps:$4 sm:$0xff]  }
  0xc7   : > { %v411_v59 = vcombine.high %v403_v55, %v403_v55  ;;  %v3550_v7 = vld [vmem:[%s4378_s20 + $0x1c8] ss:$16 sps:$4 sm:$0xff]   ;;  %v3551_v8 = vld [vmem:[%s4378_s20 + $0x1e4] ss:$16 sps:$4 sm:$0xff]   ;;  %v3553_v9 = vld [vmem:[%s4378_s20 + $0x1ec] ss:$16 sps:$4 sm:$0xff]   ;;  %v412_v15 = vcombine.high %v4461_v10, %v4461_v10  ;;  %v438_v17 = vpack.c.bf16 %v403_v55, %v403_v55 }
  0xc8   : > { %1993 = vmatpush1.bf16.msra.mxu0 %v3495_v23  ;;  %2157 = vmatpush1.bf16.msra.mxu1 %v3496_v24  ;;  %v3555_v11 = vld [vmem:[%s4378_s20 + $0x1e0] ss:$16 sps:$4 sm:$0xff]   ;;  %v3556_v12 = vld [vmem:[%s4378_s20 + $0x1e8] ss:$16 sps:$4 sm:$0xff]   ;;  %v3560_v13 = vld [vmem:[%s4378_s20 + $0x204] ss:$16 sps:$4 sm:$0xff]  }
  0xc9   : > { %1994 = vmatprep.subr.bf16.mxu0 %v3497_v25  ;;  %2158 = vmatprep.subr.bf16.mxu1 %v3499_v26  ;;  %v439_v61 = vpack.c.bf16 %v411_v59, %v411_v59  ;;  %v3563_v14 = vld [vmem:[%s4378_s20 + $0x20c] ss:$16 sps:$4 sm:$0xff]   ;;  %v3558_v16 = vld [vmem:[%s4378_s20 + $0x200] ss:$16 sps:$4 sm:$0xff]   ;;  %v3561_v18 = vld [vmem:[%s4378_s20 + $0x208] ss:$16 sps:$4 sm:$0xff]   ;;  %v441_v21 = vpack.c.bf16 %v412_v15, %v412_v15 }
  0xca   : > { %v3566_v19 = vld [vmem:[%s4378_s20 + $0x224] ss:$16 sps:$4 sm:$0xff]   ;;  %v3569_v20 = vld [vmem:[%s4378_s20 + $0x22c] ss:$16 sps:$4 sm:$0xff]   ;;  %v3564_v22 = vld [vmem:[%s4378_s20 + $0x220] ss:$16 sps:$4 sm:$0xff]  }
  0xcb   : > { %2014 = vmatprep.mubr.bf16.mxu0 %v439_v61  ;;  %2178 = vmatprep.mubr.bf16.mxu1 %v439_v61  ;;  %v3567_v23 = vld [vmem:[%s4378_s20 + $0x228] ss:$16 sps:$4 sm:$0xff]   ;;  %v3572_v24 = vld [vmem:[%s4378_s20 + $0x244] ss:$16 sps:$4 sm:$0xff]   ;;  %v3575_v25 = vld [vmem:[%s4378_s20 + $0x24c] ss:$16 sps:$4 sm:$0xff]  }
  0xcc   : > { %1995 = vmatpush1.bf16.msra.mxu0 %v3501_v27  ;;  %2159 = vmatpush1.bf16.msra.mxu1 %v3502_v28  ;;  %v3570_v26 = vld [vmem:[%s4378_s20 + $0x240] ss:$16 sps:$4 sm:$0xff]   ;;  %v3573_v27 = vld [vmem:[%s4378_s20 + $0x248] ss:$16 sps:$4 sm:$0xff]   ;;  %v3578_v28 = vld [vmem:[%s4378_s20 + $0x264] ss:$16 sps:$4 sm:$0xff]  }
  0xcd   : > { %1996 = vmatprep.subr.bf16.mxu0 %v3503_v29  ;;  %2160 = vmatprep.subr.bf16.mxu1 %v3505_v30  ;;  %v3581_v29 = vld [vmem:[%s4378_s20 + $0x26c] ss:$16 sps:$4 sm:$0xff]   ;;  %v3576_v30 = vld [vmem:[%s4378_s20 + $0x260] ss:$16 sps:$4 sm:$0xff]   ;;  %v3591_v39 = vld [vmem:[%s4378_s20 + $0x2a8] ss:$16 sps:$4 sm:$0xff]  }
  0xce   : > { %v3593_v37 = vld [vmem:[%s4378_s20 + $0x2ac] ss:$16 sps:$4 sm:$0xff]   ;;  %v3588_v38 = vld [vmem:[%s4378_s20 + $0x2a0] ss:$16 sps:$4 sm:$0xff]   ;;  %v3597_v43 = vld [vmem:[%s4378_s20 + $0x2c8] ss:$16 sps:$4 sm:$0xff]  }
  0xcf   : > { %v3602_v44 = vld [vmem:[%s4378_s20 + $0x2e4] ss:$16 sps:$4 sm:$0xff]   ;;  %v3612_v55 = vld [vmem:[%s4378_s20 + $0x320] ss:$16 sps:$4 sm:$0xff]   ;;  %v3653_v15 = vld [vmem:[%s4378_s20 + $0x3ec] ss:$16 sps:$4 sm:$0xff]  }
  0xd0   : > { %1997 = vmatpush1.bf16.msra.mxu0 %v3507_v31  ;;  %2161 = vmatpush1.bf16.msra.mxu1 %v3508_v32  ;;  %v3579_v31 = vld [vmem:[%s4378_s20 + $0x268] ss:$16 sps:$4 sm:$0xff]   ;;  %v3584_v32 = vld [vmem:[%s4378_s20 + $0x284] ss:$16 sps:$4 sm:$0xff]   ;;  %v3618_v59 = vld [vmem:[%s4378_s20 + $0x340] ss:$16 sps:$4 sm:$0xff]  }
  0xd1   : > { %1998 = vmatprep.subr.bf16.mxu0 %v3509_v33  ;;  %2162 = vmatprep.subr.bf16.mxu1 %v3511_v34  ;;  %v3587_v33 = vld [vmem:[%s4378_s20 + $0x28c] ss:$16 sps:$4 sm:$0xff]   ;;  %v3582_v34 = vld [vmem:[%s4378_s20 + $0x280] ss:$16 sps:$4 sm:$0xff]   ;;  %v3614_v53 = vld [vmem:[%s4378_s20 + $0x324] ss:$16 sps:$4 sm:$0xff]  }
  0xd2   : > { %v3626_v61 = vld [vmem:[%s4378_s20 + $0x364] ss:$16 sps:$4 sm:$0xff]   ;;  %vm4096_vm1 = vmmov (!%p3285_p13), 0   ;;  %vm2843_vm2 = vcmask (!%p3285_p13), 1043458   ;;  %vm2791_vm3 = vcmask (!%p3285_p13), 523264  }
  0xd3   : > { %v3638_v5 = vld [vmem:[%s4378_s20 + $0x3a4] ss:$16 sps:$4 sm:$0xff]  }
  0xd4   : > { %1999 = vmatpush1.bf16.msra.mxu0 %v3513_v35  ;;  %2163 = vmatpush1.bf16.msra.mxu1 %v3514_v36  ;;  %v3585_v35 = vld [vmem:[%s4378_s20 + $0x288] ss:$16 sps:$4 sm:$0xff]   ;;  %v3590_v36 = vld [vmem:[%s4378_s20 + $0x2a4] ss:$16 sps:$4 sm:$0xff]  }
  0xd5   : > { %2000 = vmatprep.subr.bf16.mxu0 %v3515_v40  ;;  %2164 = vmatprep.subr.bf16.mxu1 %v3517_v41  ;;  %v3596_v40 = vld [vmem:[%s4378_s20 + $0x2c4] ss:$16 sps:$4 sm:$0xff]   ;;  %v3599_v41 = vld [vmem:[%s4378_s20 + $0x2cc] ss:$16 sps:$4 sm:$0xff]  }
  0xd8   : > { %2001 = vmatpush1.bf16.msra.mxu0 %v3519_v42  ;;  %2165 = vmatpush1.bf16.msra.mxu1 %v3520_v45  ;;  %v3594_v42 = vld [vmem:[%s4378_s20 + $0x2c0] ss:$16 sps:$4 sm:$0xff]   ;;  %v3605_v45 = vld [vmem:[%s4378_s20 + $0x2ec] ss:$16 sps:$4 sm:$0xff]  }
  0xd9   : > { %2002 = vmatprep.subr.bf16.mxu0 %v3521_v46  ;;  %2166 = vmatprep.subr.bf16.mxu1 %v3523_v47  ;;  %v3600_v46 = vld [vmem:[%s4378_s20 + $0x2e0] ss:$16 sps:$4 sm:$0xff]   ;;  %v3603_v47 = vld [vmem:[%s4378_s20 + $0x2e8] ss:$16 sps:$4 sm:$0xff]  }
  0xdc   : > { %2003 = vmatpush1.bf16.msra.mxu0 %v3525_v48  ;;  %2167 = vmatpush1.bf16.msra.mxu1 %v3526_v49  ;;  %v3608_v48 = vld [vmem:[%s4378_s20 + $0x304] ss:$16 sps:$4 sm:$0xff]   ;;  %v3611_v49 = vld [vmem:[%s4378_s20 + $0x30c] ss:$16 sps:$4 sm:$0xff]  }
  0xdd   : > { %2004 = vmatprep.subr.bf16.mxu0 %v3527_v51  ;;  %2168 = vmatprep.subr.bf16.mxu1 %v3529_v52  ;;  %v3606_v51 = vld [vmem:[%s4378_s20 + $0x300] ss:$16 sps:$4 sm:$0xff]   ;;  %v3609_v52 = vld [vmem:[%s4378_s20 + $0x308] ss:$16 sps:$4 sm:$0xff]  }
  0xe0   : > { %2005 = vmatpush1.bf16.msra.mxu0 %v3531_v54  ;;  %2169 = vmatpush1.bf16.msra.mxu1 %v3532_v56  ;;  %v3617_v54 = vld [vmem:[%s4378_s20 + $0x32c] ss:$16 sps:$4 sm:$0xff]   ;;  %v3615_v56 = vld [vmem:[%s4378_s20 + $0x328] ss:$16 sps:$4 sm:$0xff]  }
  0xe1   : > { %2006 = vmatprep.subr.bf16.mxu0 %v3533_v57  ;;  %2170 = vmatprep.subr.bf16.mxu1 %v3535_v58  ;;  %v3620_v57 = vld [vmem:[%s4378_s20 + $0x344] ss:$16 sps:$4 sm:$0xff]   ;;  %v3623_v58 = vld [vmem:[%s4378_s20 + $0x34c] ss:$16 sps:$4 sm:$0xff]  }
  0xe4   : > { %2007 = vmatpush1.bf16.msra.mxu0 %v3537_v60  ;;  %2171 = vmatpush1.bf16.msra.mxu1 %v3538_v62  ;;  %v3621_v60 = vld [vmem:[%s4378_s20 + $0x348] ss:$16 sps:$4 sm:$0xff]   ;;  %v3629_v62 = vld [vmem:[%s4378_s20 + $0x36c] ss:$16 sps:$4 sm:$0xff]  }
  0xe5   : > { %2008 = vmatprep.subr.bf16.mxu0 %v3539_v63  ;;  %2172 = vmatprep.subr.bf16.mxu1 %v3541_v0  ;;  %v3624_v63 = vld [vmem:[%s4378_s20 + $0x360] ss:$16 sps:$4 sm:$0xff]   ;;  %v3627_v0 = vld [vmem:[%s4378_s20 + $0x368] ss:$16 sps:$4 sm:$0xff]  }
  0xe8   : > { %2009 = vmatpush1.bf16.msra.mxu0 %v3543_v1  ;;  %2173 = vmatpush1.bf16.msra.mxu1 %v3544_v2  ;;  %v3632_v1 = vld [vmem:[%s4378_s20 + $0x384] ss:$16 sps:$4 sm:$0xff]   ;;  %v3635_v2 = vld [vmem:[%s4378_s20 + $0x38c] ss:$16 sps:$4 sm:$0xff]  }
  0xe9   : > { %2010 = vmatprep.subr.bf16.mxu0 %v3545_v3  ;;  %2174 = vmatprep.subr.bf16.mxu1 %v3547_v4  ;;  %v3630_v3 = vld [vmem:[%s4378_s20 + $0x380] ss:$16 sps:$4 sm:$0xff]   ;;  %v3633_v4 = vld [vmem:[%s4378_s20 + $0x388] ss:$16 sps:$4 sm:$0xff]  }
  0xec   : > { %2011 = vmatpush1.bf16.msra.mxu0 %v3549_v6  ;;  %2175 = vmatpush1.bf16.msra.mxu1 %v3550_v7  ;;  %v3641_v6 = vld [vmem:[%s4378_s20 + $0x3ac] ss:$16 sps:$4 sm:$0xff]   ;;  %v3636_v7 = vld [vmem:[%s4378_s20 + $0x3a0] ss:$16 sps:$4 sm:$0xff]  }
  0xed   : > { %2012 = vmatprep.subr.bf16.mxu0 %v3551_v8  ;;  %2176 = vmatprep.subr.bf16.mxu1 %v3553_v9  ;;  %v3639_v8 = vld [vmem:[%s4378_s20 + $0x3a8] ss:$16 sps:$4 sm:$0xff]   ;;  %v3644_v9 = vld [vmem:[%s4378_s20 + $0x3c4] ss:$16 sps:$4 sm:$0xff]  }
  0xf0   : > { %2013 = vmatpush1.bf16.msra.mxu0 %v3555_v11  ;;  %2177 = vmatpush1.bf16.msra.mxu1 %v3556_v12  ;;  %v3647_v11 = vld [vmem:[%s4378_s20 + $0x3cc] ss:$16 sps:$4 sm:$0xff]   ;;  %v3642_v12 = vld [vmem:[%s4378_s20 + $0x3c0] ss:$16 sps:$4 sm:$0xff]  }
  0xf1   : > { %2023 = vmatprep.subr.bf16.mxu0 %v3560_v13  ;;  %2187 = vmatprep.subr.bf16.mxu1 %v3563_v14  ;;  %v3645_v13 = vld [vmem:[%s4378_s20 + $0x3c8] ss:$16 sps:$4 sm:$0xff]   ;;  %v3650_v14 = vld [vmem:[%s4378_s20 + $0x3e4] ss:$16 sps:$4 sm:$0xff]  }
  0xf3   : > { %2015 = vmatmul.mubr.bf16.vlgmr.msra.gmra.mrb[0].mxu0 %v438_v17  ;;  %2179 = vmatmul.mubr.bf16.vlgmr.msra.gmra.mrb[0].mxu1 %v438_v17  ;;  %v3651_v17 = vld [vmem:[%s4378_s20 + $0x3e8] ss:$16 sps:$4 sm:$0xff]  }
  0xf4   : > { %2024 = vmatpush1.bf16.msra.mxu0 %v3558_v16  ;;  %2188 = vmatpush1.bf16.msra.mxu1 %v3561_v18  ;;  %v3648_v16 = vld [vmem:[%s4378_s20 + $0x3e0] ss:$16 sps:$4 sm:$0xff]   ;;  %v3656_v18 = vld [vmem:[%s4378_s20 + $0x404] ss:$16 sps:$4 sm:$0xff]  }
  0xf5   : > { %2025 = vmatprep.subr.bf16.mxu0 %v3566_v19  ;;  %2189 = vmatprep.subr.bf16.mxu1 %v3569_v20  ;;  %v3659_v19 = vld [vmem:[%s4378_s20 + $0x40c] ss:$16 sps:$4 sm:$0xff]   ;;  %v3654_v20 = vld [vmem:[%s4378_s20 + $0x400] ss:$16 sps:$4 sm:$0xff]  }
  0xf6   : > { %2055 = vmatprep.mubr.bf16.mxu0 %v441_v21  ;;  %2219 = vmatprep.mubr.bf16.mxu1 %v441_v21  ;;  %v440_v21 = vpack.c.bf16 %v4461_v10, %v4461_v10 }
  0xf8   : > { %2026 = vmatpush1.bf16.msra.mxu0 %v3564_v22  ;;  %2190 = vmatpush1.bf16.msra.mxu1 %v3567_v23  ;;  %v3657_v22 = vld [vmem:[%s4378_s20 + $0x408] ss:$16 sps:$4 sm:$0xff]  }
  0xf9   : > { %2027 = vmatprep.subr.bf16.mxu0 %v3572_v24  ;;  %2191 = vmatprep.subr.bf16.mxu1 %v3575_v25  ;;  %v4540_v23 = vld [vmem:[%s4767_s0 + $0x8] sm:$0xff]  ;;  %v3665_v25 = vld [vmem:[%s4378_s20 + $0x42c] ss:$16 sps:$4 sm:$0xff]  }
  0xfa   : > { %v3662_v24 = vld [vmem:[%s4378_s20 + $0x424] ss:$16 sps:$4 sm:$0xff]  }
  0xfc   : > { %2028 = vmatpush1.bf16.msra.mxu0 %v3570_v26  ;;  %2192 = vmatpush1.bf16.msra.mxu1 %v3573_v27  ;;  %v4546_v26 = vrot.slane %v4540_v23, %v4436_v50  ;;  %v3660_v27 = vld [vmem:[%s4378_s20 + $0x420] ss:$16 sps:$4 sm:$0xff]  }
  0xfd   : > { %2029 = vmatprep.subr.bf16.mxu0 %v3578_v28  ;;  %2193 = vmatprep.subr.bf16.mxu1 %v3581_v29  ;;  %v3663_v28 = vld [vmem:[%s4378_s20 + $0x428] ss:$16 sps:$4 sm:$0xff]   ;;  %v3668_v29 = vld [vmem:[%s4378_s20 + $0x444] ss:$16 sps:$4 sm:$0xff]  }
  0xfe   : > { %v428_v10 = vcombine.high %v4546_v26, %v4546_v26 }
 0x100   : > { %2030 = vmatpush1.bf16.msra.mxu0 %v3576_v30  ;;  %2194 = vmatpush1.bf16.msra.mxu1 %v3579_v31  ;;  %v3671_v30 = vld [vmem:[%s4378_s20 + $0x44c] ss:$16 sps:$4 sm:$0xff]   ;;  %v443_v31 = vpack.c.bf16 %v428_v10, %v428_v10  ;;  %v3747_v10 = vld [vmem:[%s4378_s20 + $0x5e8] ss:$16 sps:$4 sm:$0xff]  }
 0x101   : > { %2031 = vmatprep.subr.bf16.mxu0 %v3584_v32  ;;  %2195 = vmatprep.subr.bf16.mxu1 %v3587_v33  ;;  %v3666_v32 = vld [vmem:[%s4378_s20 + $0x440] ss:$16 sps:$4 sm:$0xff]   ;;  %v3669_v33 = vld [vmem:[%s4378_s20 + $0x448] ss:$16 sps:$4 sm:$0xff]  }
 0x104   : > { %2032 = vmatpush1.bf16.msra.mxu0 %v3582_v34  ;;  %2196 = vmatpush1.bf16.msra.mxu1 %v3585_v35  ;;  %v3674_v34 = vld [vmem:[%s4378_s20 + $0x464] ss:$16 sps:$4 sm:$0xff]   ;;  %v3677_v35 = vld [vmem:[%s4378_s20 + $0x46c] ss:$16 sps:$4 sm:$0xff]  }
 0x105   : > { %2033 = vmatprep.subr.bf16.mxu0 %v3590_v36  ;;  %2197 = vmatprep.subr.bf16.mxu1 %v3593_v37  ;;  %v3672_v36 = vld [vmem:[%s4378_s20 + $0x460] ss:$16 sps:$4 sm:$0xff]   ;;  %v3675_v37 = vld [vmem:[%s4378_s20 + $0x468] ss:$16 sps:$4 sm:$0xff]  }
 0x108   : > { %2034 = vmatpush1.bf16.msra.mxu0 %v3588_v38  ;;  %2198 = vmatpush1.bf16.msra.mxu1 %v3591_v39  ;;  %v3680_v38 = vld [vmem:[%s4378_s20 + $0x484] ss:$16 sps:$4 sm:$0xff]   ;;  %v3683_v39 = vld [vmem:[%s4378_s20 + $0x48c] ss:$16 sps:$4 sm:$0xff]  }
 0x109   : > { %2035 = vmatprep.subr.bf16.mxu0 %v3596_v40  ;;  %2199 = vmatprep.subr.bf16.mxu1 %v3599_v41  ;;  %v3678_v40 = vld [vmem:[%s4378_s20 + $0x480] ss:$16 sps:$4 sm:$0xff]   ;;  %v3681_v41 = vld [vmem:[%s4378_s20 + $0x488] ss:$16 sps:$4 sm:$0xff]  }
 0x10c   : > { %2036 = vmatpush1.bf16.msra.mxu0 %v3594_v42  ;;  %2200 = vmatpush1.bf16.msra.mxu1 %v3597_v43  ;;  %v3686_v42 = vld [vmem:[%s4378_s20 + $0x4a4] ss:$16 sps:$4 sm:$0xff]   ;;  %v3689_v43 = vld [vmem:[%s4378_s20 + $0x4ac] ss:$16 sps:$4 sm:$0xff]  }
 0x10d   : > { %2037 = vmatprep.subr.bf16.mxu0 %v3602_v44  ;;  %2201 = vmatprep.subr.bf16.mxu1 %v3605_v45  ;;  %v3684_v44 = vld [vmem:[%s4378_s20 + $0x4a0] ss:$16 sps:$4 sm:$0xff]   ;;  %v3687_v45 = vld [vmem:[%s4378_s20 + $0x4a8] ss:$16 sps:$4 sm:$0xff]  }
 0x110   : > { %2038 = vmatpush1.bf16.msra.mxu0 %v3600_v46  ;;  %2202 = vmatpush1.bf16.msra.mxu1 %v3603_v47  ;;  %v3692_v46 = vld [vmem:[%s4378_s20 + $0x4c4] ss:$16 sps:$4 sm:$0xff]   ;;  %v3695_v47 = vld [vmem:[%s4378_s20 + $0x4cc] ss:$16 sps:$4 sm:$0xff]  }
 0x111   : > { %2039 = vmatprep.subr.bf16.mxu0 %v3608_v48  ;;  %2203 = vmatprep.subr.bf16.mxu1 %v3611_v49  ;;  %v3690_v48 = vld [vmem:[%s4378_s20 + $0x4c0] ss:$16 sps:$4 sm:$0xff]   ;;  %v3693_v49 = vld [vmem:[%s4378_s20 + $0x4c8] ss:$16 sps:$4 sm:$0xff]  }
 0x114   : > { %2040 = vmatpush1.bf16.msra.mxu0 %v3606_v51  ;;  %2204 = vmatpush1.bf16.msra.mxu1 %v3609_v52  ;;  %v3698_v51 = vld [vmem:[%s4378_s20 + $0x4e4] ss:$16 sps:$4 sm:$0xff]   ;;  %v3701_v52 = vld [vmem:[%s4378_s20 + $0x4ec] ss:$16 sps:$4 sm:$0xff]  }
 0x115   : > { %2041 = vmatprep.subr.bf16.mxu0 %v3614_v53  ;;  %2205 = vmatprep.subr.bf16.mxu1 %v3617_v54  ;;  %v3696_v53 = vld [vmem:[%s4378_s20 + $0x4e0] ss:$16 sps:$4 sm:$0xff]   ;;  %v3699_v54 = vld [vmem:[%s4378_s20 + $0x4e8] ss:$16 sps:$4 sm:$0xff]  }
 0x118   : > { %2042 = vmatpush1.bf16.msra.mxu0 %v3612_v55  ;;  %2206 = vmatpush1.bf16.msra.mxu1 %v3615_v56  ;;  %v3704_v55 = vld [vmem:[%s4378_s20 + $0x504] ss:$16 sps:$4 sm:$0xff]   ;;  %v3707_v56 = vld [vmem:[%s4378_s20 + $0x50c] ss:$16 sps:$4 sm:$0xff]  }
 0x119   : > { %2043 = vmatprep.subr.bf16.mxu0 %v3620_v57  ;;  %2207 = vmatprep.subr.bf16.mxu1 %v3623_v58  ;;  %v3702_v57 = vld [vmem:[%s4378_s20 + $0x500] ss:$16 sps:$4 sm:$0xff]   ;;  %v3705_v58 = vld [vmem:[%s4378_s20 + $0x508] ss:$16 sps:$4 sm:$0xff]  }
 0x11c   : > { %2044 = vmatpush1.bf16.msra.mxu0 %v3618_v59  ;;  %2208 = vmatpush1.bf16.msra.mxu1 %v3621_v60  ;;  %v3710_v59 = vld [vmem:[%s4378_s20 + $0x524] ss:$16 sps:$4 sm:$0xff]   ;;  %v3713_v60 = vld [vmem:[%s4378_s20 + $0x52c] ss:$16 sps:$4 sm:$0xff]  }
 0x11d   : > { %2045 = vmatprep.subr.bf16.mxu0 %v3626_v61  ;;  %2209 = vmatprep.subr.bf16.mxu1 %v3629_v62  ;;  %v3708_v61 = vld [vmem:[%s4378_s20 + $0x520] ss:$16 sps:$4 sm:$0xff]   ;;  %v3711_v62 = vld [vmem:[%s4378_s20 + $0x528] ss:$16 sps:$4 sm:$0xff]  }
 0x120   : > { %2046 = vmatpush1.bf16.msra.mxu0 %v3624_v63  ;;  %2210 = vmatpush1.bf16.msra.mxu1 %v3627_v0  ;;  %v3716_v63 = vld [vmem:[%s4378_s20 + $0x544] ss:$16 sps:$4 sm:$0xff]   ;;  %v3719_v0 = vld [vmem:[%s4378_s20 + $0x54c] ss:$16 sps:$4 sm:$0xff]  }
 0x121   : > { %2047 = vmatprep.subr.bf16.mxu0 %v3632_v1  ;;  %2211 = vmatprep.subr.bf16.mxu1 %v3635_v2  ;;  %v3714_v1 = vld [vmem:[%s4378_s20 + $0x540] ss:$16 sps:$4 sm:$0xff]   ;;  %v3717_v2 = vld [vmem:[%s4378_s20 + $0x548] ss:$16 sps:$4 sm:$0xff]  }
 0x124   : > { %2048 = vmatpush1.bf16.msra.mxu0 %v3630_v3  ;;  %2212 = vmatpush1.bf16.msra.mxu1 %v3633_v4  ;;  %v3722_v3 = vld [vmem:[%s4378_s20 + $0x564] ss:$16 sps:$4 sm:$0xff]   ;;  %v3725_v4 = vld [vmem:[%s4378_s20 + $0x56c] ss:$16 sps:$4 sm:$0xff]  }
 0x125   : > { %2049 = vmatprep.subr.bf16.mxu0 %v3638_v5  ;;  %2213 = vmatprep.subr.bf16.mxu1 %v3641_v6  ;;  %v3720_v5 = vld [vmem:[%s4378_s20 + $0x560] ss:$16 sps:$4 sm:$0xff]   ;;  %v3723_v6 = vld [vmem:[%s4378_s20 + $0x568] ss:$16 sps:$4 sm:$0xff]  }
 0x128   : > { %2050 = vmatpush1.bf16.msra.mxu0 %v3636_v7  ;;  %2214 = vmatpush1.bf16.msra.mxu1 %v3639_v8  ;;  %v3728_v7 = vld [vmem:[%s4378_s20 + $0x584] ss:$16 sps:$4 sm:$0xff]   ;;  %v3731_v8 = vld [vmem:[%s4378_s20 + $0x58c] ss:$16 sps:$4 sm:$0xff]  }
 0x129   : > { %2051 = vmatprep.subr.bf16.mxu0 %v3644_v9  ;;  %2215 = vmatprep.subr.bf16.mxu1 %v3647_v11  ;;  %v3726_v9 = vld [vmem:[%s4378_s20 + $0x580] ss:$16 sps:$4 sm:$0xff]   ;;  %v3729_v11 = vld [vmem:[%s4378_s20 + $0x588] ss:$16 sps:$4 sm:$0xff]  }
 0x12c   : > { %2052 = vmatpush1.bf16.msra.mxu0 %v3642_v12  ;;  %2216 = vmatpush1.bf16.msra.mxu1 %v3645_v13  ;;  %v3734_v12 = vld [vmem:[%s4378_s20 + $0x5a4] ss:$16 sps:$4 sm:$0xff]   ;;  %v3737_v13 = vld [vmem:[%s4378_s20 + $0x5ac] ss:$16 sps:$4 sm:$0xff]  }
 0x12d   : > { %2053 = vmatprep.subr.bf16.mxu0 %v3650_v14  ;;  %2217 = vmatprep.subr.bf16.mxu1 %v3653_v15  ;;  %v3732_v14 = vld [vmem:[%s4378_s20 + $0x5a0] ss:$16 sps:$4 sm:$0xff]   ;;  %v3735_v15 = vld [vmem:[%s4378_s20 + $0x5a8] ss:$16 sps:$4 sm:$0xff]  }
 0x130   : > { %2054 = vmatpush1.bf16.msra.mxu0 %v3648_v16  ;;  %2218 = vmatpush1.bf16.msra.mxu1 %v3651_v17  ;;  %v3740_v16 = vld [vmem:[%s4378_s20 + $0x5c4] ss:$16 sps:$4 sm:$0xff]   ;;  %v3743_v17 = vld [vmem:[%s4378_s20 + $0x5cc] ss:$16 sps:$4 sm:$0xff]  }
 0x131   : > { %2064 = vmatprep.subr.bf16.mxu0 %v3656_v18  ;;  %2228 = vmatprep.subr.bf16.mxu1 %v3659_v19  ;;  %v3738_v18 = vld [vmem:[%s4378_s20 + $0x5c0] ss:$16 sps:$4 sm:$0xff]   ;;  %v413_v19 = vcombine.high %v4540_v23, %v4540_v23  ;;  %v3752_v23 = vld [vmem:[%s4378_s20 + $0x604] ss:$16 sps:$4 sm:$0xff]  }
 0x133   : > { %2056 = vmatmul.mubr.bf16.vlgmr.msra.gmra.mrb[0].mxu0 %v440_v21  ;;  %2220 = vmatmul.mubr.bf16.vlgmr.msra.gmra.mrb[0].mxu1 %v440_v21  ;;  %v3746_v21 = vld [vmem:[%s4378_s20 + $0x5e4] ss:$16 sps:$4 sm:$0xff]  }
 0x134   : > { %2065 = vmatpush1.bf16.msra.mxu0 %v3654_v20  ;;  %2229 = vmatpush1.bf16.msra.mxu1 %v3657_v22  ;;  %v3741_v20 = vld [vmem:[%s4378_s20 + $0x5c8] ss:$16 sps:$4 sm:$0xff]   ;;  %v3749_v22 = vld [vmem:[%s4378_s20 + $0x5ec] ss:$16 sps:$4 sm:$0xff]  }
 0x135   : > { %2066 = vmatprep.subr.bf16.mxu0 %v3662_v24  ;;  %2230 = vmatprep.subr.bf16.mxu1 %v3665_v25  ;;  %v3744_v24 = vld [vmem:[%s4378_s20 + $0x5e0] ss:$16 sps:$4 sm:$0xff]   ;;  %v4610_v25 = vrot.slane %v413_v19, %v4436_v50  ;;  %v3833_v19 = vld [vmem:[%s4378_s20 + $0x7ac] ss:$16 sps:$4 sm:$0xff]  }
 0x136   : > { %2096 = vmatprep.mubr.bf16.mxu0 %v443_v31  ;;  %2260 = vmatprep.mubr.bf16.mxu1 %v443_v31  ;;  %v442_v31 = vpack.c.bf16 %v4546_v26, %v4546_v26  ;;  %v3767_v26 = vld [vmem:[%s4378_s20 + $0x64c] ss:$16 sps:$4 sm:$0xff]  }
 0x138   : > { %2067 = vmatpush1.bf16.msra.mxu0 %v3660_v27  ;;  %2231 = vmatpush1.bf16.msra.mxu1 %v3663_v28  ;;  %v3755_v27 = vld [vmem:[%s4378_s20 + $0x60c] ss:$16 sps:$4 sm:$0xff]   ;;  %v3750_v28 = vld [vmem:[%s4378_s20 + $0x600] ss:$16 sps:$4 sm:$0xff]  }
 0x139   : > { %2068 = vmatprep.subr.bf16.mxu0 %v3668_v29  ;;  %2232 = vmatprep.subr.bf16.mxu1 %v3671_v30  ;;  %v429_v29 = vcombine.high %v4610_v25, %v4610_v25  ;;  %v3753_v30 = vld [vmem:[%s4378_s20 + $0x608] ss:$16 sps:$4 sm:$0xff]  }
 0x13c   : > { %2069 = vmatpush1.bf16.msra.mxu0 %v3666_v32  ;;  %2233 = vmatpush1.bf16.msra.mxu1 %v3669_v33  ;;  %v3758_v32 = vld [vmem:[%s4378_s20 + $0x624] ss:$16 sps:$4 sm:$0xff]   ;;  %v3761_v33 = vld [vmem:[%s4378_s20 + $0x62c] ss:$16 sps:$4 sm:$0xff]  }
 0x13d   : > { %2070 = vmatprep.subr.bf16.mxu0 %v3674_v34  ;;  %2234 = vmatprep.subr.bf16.mxu1 %v3677_v35  ;;  %v3756_v34 = vld [vmem:[%s4378_s20 + $0x620] ss:$16 sps:$4 sm:$0xff]   ;;  %v445_v35 = vpack.c.bf16 %v429_v29, %v429_v29 }
 0x13e   : > { %v3840_v29 = vld [vmem:[%s4378_s20 + $0x7e0] ss:$16 sps:$4 sm:$0xff]  }
 0x140   : > { %2071 = vmatpush1.bf16.msra.mxu0 %v3672_v36  ;;  %2235 = vmatpush1.bf16.msra.mxu1 %v3675_v37  ;;  %v3759_v36 = vld [vmem:[%s4378_s20 + $0x628] ss:$16 sps:$4 sm:$0xff]   ;;  %v3764_v37 = vld [vmem:[%s4378_s20 + $0x644] ss:$16 sps:$4 sm:$0xff]  }
 0x141   : > { %2072 = vmatprep.subr.bf16.mxu0 %v3680_v38  ;;  %2236 = vmatprep.subr.bf16.mxu1 %v3683_v39  ;;  %v3762_v38 = vld [vmem:[%s4378_s20 + $0x640] ss:$16 sps:$4 sm:$0xff]   ;;  %v3765_v39 = vld [vmem:[%s4378_s20 + $0x648] ss:$16 sps:$4 sm:$0xff]  }
 0x144   : > { %2073 = vmatpush1.bf16.msra.mxu0 %v3678_v40  ;;  %2237 = vmatpush1.bf16.msra.mxu1 %v3681_v41  ;;  %v3770_v40 = vld [vmem:[%s4378_s20 + $0x664] ss:$16 sps:$4 sm:$0xff]   ;;  %v3773_v41 = vld [vmem:[%s4378_s20 + $0x66c] ss:$16 sps:$4 sm:$0xff]  }
 0x145   : > { %2074 = vmatprep.subr.bf16.mxu0 %v3686_v42  ;;  %2238 = vmatprep.subr.bf16.mxu1 %v3689_v43  ;;  %v3768_v42 = vld [vmem:[%s4378_s20 + $0x660] ss:$16 sps:$4 sm:$0xff]   ;;  %v3771_v43 = vld [vmem:[%s4378_s20 + $0x668] ss:$16 sps:$4 sm:$0xff]  }
 0x148   : > { %2075 = vmatpush1.bf16.msra.mxu0 %v3684_v44  ;;  %2239 = vmatpush1.bf16.msra.mxu1 %v3687_v45  ;;  %v3776_v44 = vld [vmem:[%s4378_s20 + $0x684] ss:$16 sps:$4 sm:$0xff]   ;;  %v3779_v45 = vld [vmem:[%s4378_s20 + $0x68c] ss:$16 sps:$4 sm:$0xff]  }
 0x149   : > { %2076 = vmatprep.subr.bf16.mxu0 %v3692_v46  ;;  %2240 = vmatprep.subr.bf16.mxu1 %v3695_v47  ;;  %v3774_v46 = vld [vmem:[%s4378_s20 + $0x680] ss:$16 sps:$4 sm:$0xff]   ;;  %v3777_v47 = vld [vmem:[%s4378_s20 + $0x688] ss:$16 sps:$4 sm:$0xff]  }
 0x14c   : > { %2077 = vmatpush1.bf16.msra.mxu0 %v3690_v48  ;;  %2241 = vmatpush1.bf16.msra.mxu1 %v3693_v49  ;;  %v3782_v48 = vld [vmem:[%s4378_s20 + $0x6a4] ss:$16 sps:$4 sm:$0xff]   ;;  %v3785_v49 = vld [vmem:[%s4378_s20 + $0x6ac] ss:$16 sps:$4 sm:$0xff]  }
 0x14d   : > { %2078 = vmatprep.subr.bf16.mxu0 %v3698_v51  ;;  %2242 = vmatprep.subr.bf16.mxu1 %v3701_v52  ;;  %v3780_v51 = vld [vmem:[%s4378_s20 + $0x6a0] ss:$16 sps:$4 sm:$0xff]   ;;  %v3783_v52 = vld [vmem:[%s4378_s20 + $0x6a8] ss:$16 sps:$4 sm:$0xff]  }
 0x150   : > { %2079 = vmatpush1.bf16.msra.mxu0 %v3696_v53  ;;  %2243 = vmatpush1.bf16.msra.mxu1 %v3699_v54  ;;  %v3788_v53 = vld [vmem:[%s4378_s20 + $0x6c4] ss:$16 sps:$4 sm:$0xff]   ;;  %v3791_v54 = vld [vmem:[%s4378_s20 + $0x6cc] ss:$16 sps:$4 sm:$0xff]  }
 0x151   : > { %2080 = vmatprep.subr.bf16.mxu0 %v3704_v55  ;;  %2244 = vmatprep.subr.bf16.mxu1 %v3707_v56  ;;  %v3786_v55 = vld [vmem:[%s4378_s20 + $0x6c0] ss:$16 sps:$4 sm:$0xff]   ;;  %v3789_v56 = vld [vmem:[%s4378_s20 + $0x6c8] ss:$16 sps:$4 sm:$0xff]  }
 0x154   : > { %2081 = vmatpush1.bf16.msra.mxu0 %v3702_v57  ;;  %2245 = vmatpush1.bf16.msra.mxu1 %v3705_v58  ;;  %v3794_v57 = vld [vmem:[%s4378_s20 + $0x6e4] ss:$16 sps:$4 sm:$0xff]   ;;  %v3797_v58 = vld [vmem:[%s4378_s20 + $0x6ec] ss:$16 sps:$4 sm:$0xff]  }
 0x155   : > { %2082 = vmatprep.subr.bf16.mxu0 %v3710_v59  ;;  %2246 = vmatprep.subr.bf16.mxu1 %v3713_v60  ;;  %v3792_v59 = vld [vmem:[%s4378_s20 + $0x6e0] ss:$16 sps:$4 sm:$0xff]   ;;  %v3795_v60 = vld [vmem:[%s4378_s20 + $0x6e8] ss:$16 sps:$4 sm:$0xff]  }
 0x158   : > { %2083 = vmatpush1.bf16.msra.mxu0 %v3708_v61  ;;  %2247 = vmatpush1.bf16.msra.mxu1 %v3711_v62  ;;  %v3800_v61 = vld [vmem:[%s4378_s20 + $0x704] ss:$16 sps:$4 sm:$0xff]   ;;  %v3803_v62 = vld [vmem:[%s4378_s20 + $0x70c] ss:$16 sps:$4 sm:$0xff]  }
 0x159   : > { %2084 = vmatprep.subr.bf16.mxu0 %v3716_v63  ;;  %2248 = vmatprep.subr.bf16.mxu1 %v3719_v0  ;;  %v3798_v63 = vld [vmem:[%s4378_s20 + $0x700] ss:$16 sps:$4 sm:$0xff]   ;;  %v3801_v0 = vld [vmem:[%s4378_s20 + $0x708] ss:$16 sps:$4 sm:$0xff]  }
 0x15c   : > { %2085 = vmatpush1.bf16.msra.mxu0 %v3714_v1  ;;  %2249 = vmatpush1.bf16.msra.mxu1 %v3717_v2  ;;  %v3806_v1 = vld [vmem:[%s4378_s20 + $0x724] ss:$16 sps:$4 sm:$0xff]   ;;  %v3809_v2 = vld [vmem:[%s4378_s20 + $0x72c] ss:$16 sps:$4 sm:$0xff]  }
 0x15d   : > { %2086 = vmatprep.subr.bf16.mxu0 %v3722_v3  ;;  %2250 = vmatprep.subr.bf16.mxu1 %v3725_v4  ;;  %v3804_v3 = vld [vmem:[%s4378_s20 + $0x720] ss:$16 sps:$4 sm:$0xff]   ;;  %v3807_v4 = vld [vmem:[%s4378_s20 + $0x728] ss:$16 sps:$4 sm:$0xff]  }
 0x160   : > { %2087 = vmatpush1.bf16.msra.mxu0 %v3720_v5  ;;  %2251 = vmatpush1.bf16.msra.mxu1 %v3723_v6  ;;  %v3812_v5 = vld [vmem:[%s4378_s20 + $0x744] ss:$16 sps:$4 sm:$0xff]   ;;  %v3815_v6 = vld [vmem:[%s4378_s20 + $0x74c] ss:$16 sps:$4 sm:$0xff]  }
 0x161   : > { %2088 = vmatprep.subr.bf16.mxu0 %v3728_v7  ;;  %2252 = vmatprep.subr.bf16.mxu1 %v3731_v8  ;;  %v3810_v7 = vld [vmem:[%s4378_s20 + $0x740] ss:$16 sps:$4 sm:$0xff]   ;;  %v3813_v8 = vld [vmem:[%s4378_s20 + $0x748] ss:$16 sps:$4 sm:$0xff]  }
 0x164   : > { %2089 = vmatpush1.bf16.msra.mxu0 %v3726_v9  ;;  %2253 = vmatpush1.bf16.msra.mxu1 %v3729_v11  ;;  %v3818_v9 = vld [vmem:[%s4378_s20 + $0x764] ss:$16 sps:$4 sm:$0xff]   ;;  %v3821_v11 = vld [vmem:[%s4378_s20 + $0x76c] ss:$16 sps:$4 sm:$0xff]  }
 0x165   : > { %2090 = vmatprep.subr.bf16.mxu0 %v3734_v12  ;;  %2254 = vmatprep.subr.bf16.mxu1 %v3737_v13  ;;  %v3816_v12 = vld [vmem:[%s4378_s20 + $0x760] ss:$16 sps:$4 sm:$0xff]   ;;  %v3819_v13 = vld [vmem:[%s4378_s20 + $0x768] ss:$16 sps:$4 sm:$0xff]  }
 0x168   : > { %2091 = vmatpush1.bf16.msra.mxu0 %v3732_v14  ;;  %2255 = vmatpush1.bf16.msra.mxu1 %v3735_v15  ;;  %v3824_v14 = vld [vmem:[%s4378_s20 + $0x784] ss:$16 sps:$4 sm:$0xff]   ;;  %v3827_v15 = vld [vmem:[%s4378_s20 + $0x78c] ss:$16 sps:$4 sm:$0xff]  }
 0x169   : > { %2092 = vmatprep.subr.bf16.mxu0 %v3740_v16  ;;  %2256 = vmatprep.subr.bf16.mxu1 %v3743_v17  ;;  %v3822_v16 = vld [vmem:[%s4378_s20 + $0x780] ss:$16 sps:$4 sm:$0xff]   ;;  %v3825_v17 = vld [vmem:[%s4378_s20 + $0x788] ss:$16 sps:$4 sm:$0xff]  }
 0x16c   : > { %2093 = vmatpush1.bf16.msra.mxu0 %v3738_v18  ;;  %2257 = vmatpush1.bf16.msra.mxu1 %v3741_v20  ;;  %v3830_v18 = vld [vmem:[%s4378_s20 + $0x7a4] ss:$16 sps:$4 sm:$0xff]   ;;  %v3828_v20 = vld [vmem:[%s4378_s20 + $0x7a0] ss:$16 sps:$4 sm:$0xff]  }
 0x16d   : > { %2094 = vmatprep.subr.bf16.mxu0 %v3746_v21  ;;  %2258 = vmatprep.subr.bf16.mxu1 %v3749_v22  ;;  %v3831_v21 = vld [vmem:[%s4378_s20 + $0x7a8] ss:$16 sps:$4 sm:$0xff]   ;;  %v3836_v22 = vld [vmem:[%s4378_s20 + $0x7c4] ss:$16 sps:$4 sm:$0xff]  }
 0x170   : > { %2095 = vmatpush1.bf16.msra.mxu0 %v3744_v24  ;;  %2259 = vmatpush1.bf16.msra.mxu1 %v3747_v10  ;;  %v3839_v24 = vld [vmem:[%s4378_s20 + $0x7cc] ss:$16 sps:$4 sm:$0xff]   ;;  %v3834_v10 = vld [vmem:[%s4378_s20 + $0x7c0] ss:$16 sps:$4 sm:$0xff]  }
 0x171   : > { %2105 = vmatprep.subr.bf16.mxu0 %v3752_v23  ;;  %2269 = vmatprep.subr.bf16.mxu1 %v3755_v27  ;;  %v3837_v23 = vld [vmem:[%s4378_s20 + $0x7c8] ss:$16 sps:$4 sm:$0xff]   ;;  %v3842_v27 = vld [vmem:[%s4378_s20 + $0x7e4] ss:$16 sps:$4 sm:$0xff]  }
 0x173   : > { %2097 = vmatmul.mubr.bf16.vlgmr.msra.gmra.mrb[0].mxu0 %v442_v31  ;;  %2261 = vmatmul.mubr.bf16.vlgmr.msra.gmra.mrb[0].mxu1 %v442_v31  ;;  %v3847_v31 = vld [vmem:[%s4384_s15 + $0x40] sm:$0xff]  }
 0x174   : > { %2106 = vmatpush1.bf16.msra.mxu0 %v3750_v28  ;;  %2270 = vmatpush1.bf16.msra.mxu1 %v3753_v30  ;;  %v3845_v28 = vld [vmem:[%s4378_s20 + $0x7ec] ss:$16 sps:$4 sm:$0xff]   ;;  %v3843_v30 = vld [vmem:[%s4378_s20 + $0x7e8] ss:$16 sps:$4 sm:$0xff]  }
 0x175   : > { %2107 = vmatprep.subr.bf16.mxu0 %v3758_v32  ;;  %2271 = vmatprep.subr.bf16.mxu1 %v3761_v33  ;;  %v3848_v32 = vld [vmem:[%s4384_s15 + $0xc0] sm:$0xff]   ;;  %v444_v33 = vpack.c.bf16 %v4610_v25, %v4610_v25  ;;  %v3854_v25 = vld [vmem:[%s4384_s15 + $0x88] sm:$0xff]  }
 0x176   : > { %2137 = vmatprep.mubr.bf16.mxu0 %v445_v35  ;;  %2301 = vmatprep.mubr.bf16.mxu1 %v445_v35  ;;  %v3850_v35 = vld [vmem:[%s4384_s15 + $0x80] sm:$0xff]  }
 0x178   : > { %2108 = vmatpush1.bf16.msra.mxu0 %v3756_v34  ;;  %2272 = vmatpush1.bf16.msra.mxu1 %v3759_v36  ;;  %v3849_v34 = vld [vmem:[%s4384_s15] sm:$0xff]   ;;  %v3851_v36 = vld [vmem:[%s4384_s15 + $0x48] sm:$0xff]  }
 0x179   : > { %2109 = vmatprep.subr.bf16.mxu0 %v3764_v37  ;;  %2273 = vmatprep.subr.bf16.mxu1 %v3767_v26  ;;  %v3852_v37 = vld [vmem:[%s4384_s15 + $0xc8] sm:$0xff]  }
 0x17a   : > { %v3853_v26 = vld [vmem:[%s4384_s15 + $0x8] sm:$0xff]  }
 0x17c   : > { %2110 = vmatpush1.bf16.msra.mxu0 %v3762_v38  ;;  %2274 = vmatpush1.bf16.msra.mxu1 %v3765_v39  ;;  %v3855_v38 = vld [vmem:[%s4384_s15 + $0x50] sm:$0xff]  }
 0x17d   : > { %2111 = vmatprep.subr.bf16.mxu0 %v3770_v40  ;;  %2275 = vmatprep.subr.bf16.mxu1 %v3773_v41  ;;  %v3856_v39 = vld [vmem:[%s4384_s15 + $0xd0] sm:$0xff]  }
 0x17e   : > { %v3857_v40 = vld [vmem:[%s4384_s15 + $0x10] sm:$0xff]  }
 0x17f   : > { %v3858_v41 = vld [vmem:[%s4384_s15 + $0x90] sm:$0xff]  }
 0x180   : > { %2112 = vmatpush1.bf16.msra.mxu0 %v3768_v42  ;;  %2276 = vmatpush1.bf16.msra.mxu1 %v3771_v43  ;;  %v3859_v42 = vld [vmem:[%s4384_s15 + $0x58] sm:$0xff]  }
 0x181   : > { %2113 = vmatprep.subr.bf16.mxu0 %v3776_v44  ;;  %2277 = vmatprep.subr.bf16.mxu1 %v3779_v45  ;;  %v3860_v43 = vld [vmem:[%s4384_s15 + $0xd8] sm:$0xff]  }
 0x182   : > { %v3861_v44 = vld [vmem:[%s4384_s15 + $0x18] sm:$0xff]  }
 0x183   : > { %v3862_v45 = vld [vmem:[%s4384_s15 + $0x98] sm:$0xff]  }
 0x184   : > { %2114 = vmatpush1.bf16.msra.mxu0 %v3774_v46  ;;  %2278 = vmatpush1.bf16.msra.mxu1 %v3777_v47  ;;  %v3863_v46 = vld [vmem:[%s4384_s15 + $0x60] sm:$0xff]  }
 0x185   : > { %2115 = vmatprep.subr.bf16.mxu0 %v3782_v48  ;;  %2279 = vmatprep.subr.bf16.mxu1 %v3785_v49  ;;  %v3864_v47 = vld [vmem:[%s4384_s15 + $0xe0] sm:$0xff]  }
 0x186   : > { %v3865_v48 = vld [vmem:[%s4384_s15 + $0x20] sm:$0xff]  }
 0x187   : > { %v3866_v49 = vld [vmem:[%s4384_s15 + $0xa0] sm:$0xff]  }
 0x188   : > { %2116 = vmatpush1.bf16.msra.mxu0 %v3780_v51  ;;  %2280 = vmatpush1.bf16.msra.mxu1 %v3783_v52  ;;  %v3867_v51 = vld [vmem:[%s4384_s15 + $0x68] sm:$0xff]  }
 0x189   : > { %2117 = vmatprep.subr.bf16.mxu0 %v3788_v53  ;;  %2281 = vmatprep.subr.bf16.mxu1 %v3791_v54  ;;  %v3868_v52 = vld [vmem:[%s4384_s15 + $0xe8] sm:$0xff]  }
 0x18a   : > { %v3869_v53 = vld [vmem:[%s4384_s15 + $0x28] sm:$0xff]  }
 0x18b   : > { %v3870_v54 = vld [vmem:[%s4384_s15 + $0xa8] sm:$0xff]  }
 0x18c   : > { %2118 = vmatpush1.bf16.msra.mxu0 %v3786_v55  ;;  %2282 = vmatpush1.bf16.msra.mxu1 %v3789_v56  ;;  %v3871_v55 = vld [vmem:[%s4384_s15 + $0x70] sm:$0xff]  }
 0x18d   : > { %2119 = vmatprep.subr.bf16.mxu0 %v3794_v57  ;;  %2283 = vmatprep.subr.bf16.mxu1 %v3797_v58  ;;  %v3872_v56 = vld [vmem:[%s4384_s15 + $0xf0] sm:$0xff]  }
 0x18e   : > { %v3873_v57 = vld [vmem:[%s4384_s15 + $0x30] sm:$0xff]  }
 0x18f   : > { %v3874_v58 = vld [vmem:[%s4384_s15 + $0xb0] sm:$0xff]  }
 0x190   : > { %2120 = vmatpush1.bf16.msra.mxu0 %v3792_v59  ;;  %2284 = vmatpush1.bf16.msra.mxu1 %v3795_v60  ;;  %v3876_v59 = vld [vmem:[%s4384_s15 + $0x78] sm:$0xff]  }
 0x191   : > { %2121 = vmatprep.subr.bf16.mxu0 %v3800_v61  ;;  %2285 = vmatprep.subr.bf16.mxu1 %v3803_v62  ;;  %v3877_v60 = vld [vmem:[%s4384_s15 + $0xf8] sm:$0xff]  }
 0x192   : > { %v3878_v61 = vld [vmem:[%s4384_s15 + $0x38] sm:$0xff]  }
 0x193   : > { %v3879_v62 = vld [vmem:[%s4384_s15 + $0xb8] sm:$0xff]  }
 0x194   : > { %2122 = vmatpush1.bf16.msra.mxu0 %v3798_v63  ;;  %2286 = vmatpush1.bf16.msra.mxu1 %v3801_v0  ;;  %v2310_v63 = vld [vmem:[%s4368_s16] sm:$0xff] }
 0x195   : > { %2123 = vmatprep.subr.bf16.mxu0 %v3806_v1  ;;  %2287 = vmatprep.subr.bf16.mxu1 %v3809_v2  ;;  %v2312_v0 = vcombine.low %v2310_v63, %v2310_v63  ;;  %v2326_v2 = vrot.slane %v2310_v63, %v4436_v50 }
 0x197   : > { %v2319_v1 = vrot.slane %v2312_v0, %v4436_v50 }
 0x198   : > { %2124 = vmatpush1.bf16.msra.mxu0 %v3804_v3  ;;  %2288 = vmatpush1.bf16.msra.mxu1 %v3807_v4  ;;  %v2328_v4 = vcombine.high %v2326_v2, %v2326_v2 }
 0x199   : > { %2125 = vmatprep.subr.bf16.mxu0 %v3812_v5  ;;  %2289 = vmatprep.subr.bf16.mxu1 %v3815_v6  ;;  %v2327_v3 = vcombine.high %v2319_v1, %v2319_v1 }
 0x19c   : > { %2126 = vmatpush1.bf16.msra.mxu0 %v3810_v7  ;;  %2290 = vmatpush1.bf16.msra.mxu1 %v3813_v8 }
 0x19d   : > { %2127 = vmatprep.subr.bf16.mxu0 %v3818_v9  ;;  %2291 = vmatprep.subr.bf16.mxu1 %v3821_v11 }
 0x1a0   : > { %2128 = vmatpush1.bf16.msra.mxu0 %v3816_v12  ;;  %2292 = vmatpush1.bf16.msra.mxu1 %v3819_v13 }
 0x1a1   : > { %2129 = vmatprep.subr.bf16.mxu0 %v3824_v14  ;;  %2293 = vmatprep.subr.bf16.mxu1 %v3827_v15 }
 0x1a4   : > { %2130 = vmatpush1.bf16.msra.mxu0 %v3822_v16  ;;  %2294 = vmatpush1.bf16.msra.mxu1 %v3825_v17 }
 0x1a5   : > { %2131 = vmatprep.subr.bf16.mxu0 %v3830_v18  ;;  %2295 = vmatprep.subr.bf16.mxu1 %v3833_v19 }
 0x1a8   : > { %2132 = vmatpush1.bf16.msra.mxu0 %v3828_v20  ;;  %2296 = vmatpush1.bf16.msra.mxu1 %v3831_v21 }
 0x1a9   : > { %2133 = vmatprep.subr.bf16.mxu0 %v3836_v22  ;;  %2297 = vmatprep.subr.bf16.mxu1 %v3839_v24 }
 0x1ac   : > { %2134 = vmatpush1.bf16.msra.mxu0 %v3834_v10  ;;  %2298 = vmatpush1.bf16.msra.mxu1 %v3837_v23 }
 0x1ad   : > { %2135 = vmatprep.subr.bf16.mxu0 %v3842_v27  ;;  %2299 = vmatprep.subr.bf16.mxu1 %v3845_v28 }
 0x1b0   : > { %2136 = vmatpush1.bf16.msra.mxu0 %v3840_v29  ;;  %2300 = vmatpush1.bf16.msra.mxu1 %v3843_v30 }
 0x1b1   : > { %3296 = vmatprep.subr.bf16.mxu0 %v3847_v31  ;;  %3318 = vmatprep.subr.bf16.mxu1 %v3848_v32  ;;  %v2338_v31 = vld [vmem:[#allocation2] sm:$0xf] }
 0x1b3   : > { %2138 = vmatmul.mubr.bf16.vlgmr.msra.gmra.mrb[0].mxu0 %v444_v33  ;;  %2302 = vmatmul.mubr.bf16.vlgmr.msra.gmra.mrb[0].mxu1 %v444_v33 }
 0x1b4   : > { %3297 = vmatpush3.bf16.msra.mxu0 %v3849_v34  ;;  %3319 = vmatpush3.bf16.msra.mxu1 %v3850_v35 }
 0x1b5   : > { %3298 = vmatprep.subr.bf16.mxu0 %v3851_v36  ;;  %3320 = vmatprep.subr.bf16.mxu1 %v3852_v37  ;;  %v3881_v36 = vld [vmem:[#allocation9] sm:$0xff] (!%p3285_p13)   ;;  %v4095_v37 = vmov (!%p3285_p13), 0.0  }
 0x1b8   : > { %3299 = vmatpush3.bf16.msra.mxu0 %v3853_v26  ;;  %3321 = vmatpush3.bf16.msra.mxu1 %v3854_v25  ;;  %v3882_v26 = vld [vmem:[#allocation9 + $0x8] sm:$0xff] (!%p3285_p13)  }
 0x1b9   : > { %3300 = vmatprep.subr.bf16.mxu0 %v3855_v38  ;;  %3322 = vmatprep.subr.bf16.mxu1 %v3856_v39  ;;  %v3883_v39 = vld [vmem:[#allocation9 + $0x10] sm:$0xff] (!%p3285_p13)  }
 0x1bc   : > { %3301 = vmatpush3.bf16.msra.mxu0 %v3857_v40  ;;  %3323 = vmatpush3.bf16.msra.mxu1 %v3858_v41  ;;  %v3884_v41 = vld [vmem:[#allocation9 + $0x18] sm:$0xff] (!%p3285_p13)  }
 0x1bd   : > { %3302 = vmatprep.subr.bf16.mxu0 %v3859_v42  ;;  %3324 = vmatprep.subr.bf16.mxu1 %v3860_v43  ;;  %v2757_v42 = vld [vmem:[#allocation5] sm:$0x3] (!%p3285_p13) }
 0x1be   : > { %v2758_v43 = vpack.c.bf16 (!%p3285_p13), %v2757_v42, %v2757_v42 }
 0x1c0   : > { %3303 = vmatpush3.bf16.msra.mxu0 %v3861_v44  ;;  %3325 = vmatpush3.bf16.msra.mxu1 %v3862_v45  ;;  %v2685_v45 = vld [vmem:[%s4767_s0] sm:$0xff] (!%p3285_p13) }
 0x1c1   : > { %3304 = vmatprep.subr.bf16.mxu0 %v3863_v46  ;;  %3326 = vmatprep.subr.bf16.mxu1 %v3864_v47  ;;  %v2687_v46 = vld [vmem:[%s4768_s1] sm:$0xff] (!%p3285_p13) }
 0x1c2   : > { %v2689_v47 = vsub.f32 (!%p3285_p13), %v2685_v45, %v2687_v46 }
 0x1c4   : > { %3305 = vmatpush3.bf16.msra.mxu0 %v3865_v48  ;;  %3327 = vmatpush3.bf16.msra.mxu1 %v3866_v49  ;;  %v2691_v48 = vmul.f32 (!%p3285_p13), %v2689_v47, %v2689_v47 }
 0x1c5   : > { %3306 = vmatprep.subr.bf16.mxu0 %v3867_v51  ;;  %3328 = vmatprep.subr.bf16.mxu1 %v3868_v52 }
 0x1c6   : > { %v2702_v49 = vrot.slane (!%p3285_p13), %v2691_v48, %v4436_v50  ;;  %v2695_v51 = vcombine.high (!%p3285_p13), %v2691_v48, %v2691_v48 }
 0x1c8   : > { %3307 = vmatpush3.bf16.msra.mxu0 %v3869_v53  ;;  %3329 = vmatpush3.bf16.msra.mxu1 %v3870_v54  ;;  %v2710_v52 = vcombine.high (!%p3285_p13), %v2702_v49, %v2702_v49  ;;  %v2686_v53 = vld [vmem:[%s4767_s0 + $0x8] sm:$0xff] (!%p3285_p13) }
 0x1c9   : > { %3308 = vmatprep.subr.bf16.mxu0 %v3871_v55  ;;  %3330 = vmatprep.subr.bf16.mxu1 %v3872_v56  ;;  %v2688_v54 = vld [vmem:[%s4768_s1 + $0x8] sm:$0xff] (!%p3285_p13)  ;;  %v2709_v56 = vrot.slane (!%p3285_p13), %v2695_v51, %v4436_v50 }
 0x1ca   : > { %v2690_v55 = vsub.f32 (!%p3285_p13), %v2686_v53, %v2688_v54 }
 0x1cc   : > { %3309 = vmatpush3.bf16.msra.mxu0 %v3873_v57  ;;  %3331 = vmatpush3.bf16.msra.mxu1 %v3874_v58  ;;  %v2737_v57 = vsel (!%p3285_p13), %vm2333_vm0, %v2702_v49, 0.0  ;;  %v2738_v58 = vsel (!%p3285_p13), %vm2333_vm0, %v2710_v52, 0.0 }
 0x1cd   : > { %3310 = vmatprep.subr.bf16.mxu0 %v3876_v59  ;;  %3332 = vmatprep.subr.bf16.mxu1 %v3877_v60  ;;  %v2739_v59 = vadd.f32 (!%p3285_p13), %v2738_v58, %v2737_v57  ;;  %v2692_v60 = vmul.f32 (!%p3285_p13), %v2690_v55, %v2690_v55 }
 0x1cf   : > { %v2719_v0 = vrot.slane (!%p3285_p13), %v2692_v60, %v4436_v50 }
 0x1d0   : > { %3311 = vmatpush3.bf16.msra.mxu0 %v3878_v61  ;;  %3333 = vmatpush3.bf16.msra.mxu1 %v3879_v62  ;;  %v2711_v61 = vcombine.high (!%p3285_p13), %v2709_v56, %v2709_v56  ;;  %v2740_v62 = vsel (!%p3285_p13), %vm2333_vm0, %v2709_v56, 0.0 }
 0x1d1   : > { %3345 = vmatprep.subr.bf16.mxu0 (!%p3285_p13), %v4095_v37  ;;  %v2741_v63 = vadd.f32 (!%p3285_p13), %v2740_v62, %v2739_v59 }
 0x286   : > { %v2139_v5 = vpop.f32.mrb[0].mxu0  ;;  %v2303_v6 = vpop.f32.mrb[0].mxu1 }
 0x287   : > { %v2334_v7 = vsel %vm2333_vm0, %v2139_v5, %v2319_v1  ;;  %v2336_v8 = vsel %vm2333_vm0, %v2303_v6, %v2326_v2  ;;  %v2141_v9 = vpop.f32.mrb[1].mxu0  ;;  %v2305_v11 = vpop.f32.mrb[1].mxu1  ;;  %v2742_v1 = vsel (!%p3285_p13), %vm2333_vm0, %v2711_v61, 0.0  ;;  %v2744_v5 = vsel (!%p3285_p13), %vm2333_vm0, %v2719_v0, 0.0 }
 0x288   : > { %v2335_v12 = vsel %vm2333_vm0, %v2141_v9, %v2327_v3  ;;  %v2337_v13 = vsel %vm2333_vm0, %v2305_v11, %v2328_v4  ;;  %v2143_v14 = vpop.f32.mrb[2].mxu0  ;;  %v2307_v15 = vpop.f32.mrb[2].mxu1  ;;  %v2339_v20 = vpack.c.bf16 %v2334_v7, %v2334_v7  ;;  %v2341_v21 = vpack.c.bf16 %v2336_v8, %v2336_v8 }
 0x289   : > { %v2340_v16 = vpack.c.bf16 %v2335_v12, %v2335_v12  ;;  %v2342_v17 = vpack.c.bf16 %v2337_v13, %v2337_v13  ;;  %v2144_v18 = vpop.f32.mrb[3].mxu0  ;;  %v2308_v19 = vpop.f32.mrb[3].mxu1  ;;  %v2743_v2 = vadd.f32 (!%p3285_p13), %v2742_v1, %v2741_v63  ;;  %v2712_v3 = vcombine.high (!%p3285_p13), %v2692_v60, %v2692_v60 }
 0x28a   : > { %v2727_v4 = vcombine.high (!%p3285_p13), %v2719_v0, %v2719_v0 }
 0x28b   : > { %2631 = vmatprep.mubr.bf16.mxu0 %v2340_v16  ;;  %2671 = vmatprep.mubr.bf16.mxu1 %v2342_v17  ;;  %v2745_v6 = vadd.f32 (!%p3285_p13), %v2744_v5, %v2743_v2  ;;  %v2726_v7 = vrot.slane (!%p3285_p13), %v2712_v3, %v4436_v50 }
 0x28c   : > { %2632 = vmatmul.mubr.bf16.vlgmr.msra.gmra.mrb[4].mxu0 %v2339_v20  ;;  %2672 = vmatmul.mubr.bf16.vlgmr.msra.gmra.mrb[4].mxu1 %v2341_v21  ;;  %v2746_v8 = vsel (!%p3285_p13), %vm2333_vm0, %v2727_v4, 0.0 }
 0x28d   : > { %3346 = vmatpush3.bf16.msra.mxu0 (!%p3285_p13), %v3881_v36  ;;  %3353 = vmatprep.mubr.msk.bf16.mxu0 (!%p3285_p13), %vm4096_vm1, %v4095_v37  ;;  %v2747_v9 = vadd.f32 (!%p3285_p13), %v2746_v8, %v2745_v6  ;;  %v2728_v12 = vcombine.high (!%p3285_p13), %v2726_v7, %v2726_v7  ;;  %v2748_v13 = vsel (!%p3285_p13), %vm2333_vm0, %v2726_v7, 0.0 }
 0x28e   : > { %3347 = vmatprep.subr.bf16.mxu0 (!%p3285_p13), %v4095_v37 }
 0x28f   : > { %v2749_v15 = vadd.f32 (!%p3285_p13), %v2748_v13, %v2747_v9  ;;  %v2750_v20 = vsel (!%p3285_p13), %vm2333_vm0, %v2728_v12, 0.0 }
 0x291   : > { %3348 = vmatpush3.bf16.msra.mxu0 (!%p3285_p13), %v3882_v26 }
 0x292   : > { %3349 = vmatprep.subr.bf16.mxu0 (!%p3285_p13), %v4095_v37 }
 0x295   : > { %3350 = vmatpush3.bf16.msra.mxu0 (!%p3285_p13), %v3883_v39 }
 0x296   : > { %3351 = vmatprep.subr.bf16.mxu0 (!%p3285_p13), %v4095_v37 }
 0x299   : > { %3352 = vmatpush3.bf16.msra.mxu0 (!%p3285_p13), %v3884_v41 }
 0x29c   : > { %3354 = vmatmul.mubr.msk.bf16.vlgmr.msra.gmra.mrb[0].mxu0 (!%p3285_p13), %vm2791_vm3, %v2758_v43 }
 0x35f   : > { %v3312_v22 = vpop.f32.mrb[4].mxu0  ;;  %v3334_v24 = vpop.f32.mrb[4].mxu1 }
 0x360   : > { %v3313_v10 = vpop.f32.mrb[5].mxu0  ;;  %v3335_v23 = vpop.f32.mrb[5].mxu1 }
 0x361   : > { %v3314_v27 = vadd.f32 %v3313_v10, %v3312_v22  ;;  %v3336_v28 = vadd.f32 %v3335_v23, %v3334_v24  ;;  %v3315_v29 = vpop.f32.mrb[6].mxu0  ;;  %v3337_v30 = vpop.f32.mrb[6].mxu1  ;;  %2684 = sbr.rel (%p3285_p13) target bundleno = 1180 (0x49c), region = 76  ;;  %v2751_v10 = vadd.f32 (!%p3285_p13), %v2750_v20, %v2749_v15 }
 0x362   : > { %v3316_v32 = vpop.f32.mrb[7].mxu0  ;;  %v3338_v33 = vpop.f32.mrb[7].mxu1 }
 0x363   : > { %v2674_v34 = vadd.f32 %v3336_v28, %v3314_v27  ;;  %v4097_v27 = vmov (!%p3285_p13), 0  }
 0x364   : > { %3880 = vset.pattern.permute.xlu0 (!%p3285_p13), %v4097_v27 }
 0x365   : > { %v2679_v35 = vadd.f32 %v2674_v34, %v2338_v31 }
 0x367   : > { %2680 = vst [vmem:[#allocation2] sm:$0xf] %v2679_v35 }
 0x36e   : > { %v2756_v25 = vld [vmem:[#allocation2] sm:$0xf] }
 0x36f   : > { %v2835_v38 = vmul.f32 %v2756_v25, %v2756_v25  ;;  %v2852_v11 = vrot.slane %v2756_v25, 2  ;;  %v2829_v14 = vpop.f32.mrb[0].mxu0 }
 0x370   : > { %v3355_v16 = vpop.f32.mrb[1].mxu0  ;;  %v2847_v17 = vmul.f32 %v2829_v14, %v2756_v25  ;;  %v2839_v18 = vmul.f32 %v2829_v14, %v2829_v14 }
 0x371   : > { %v2844_v40 = vsel %vm2843_vm2, %v2835_v38, 0.0  ;;  %v2836_v44 = vsel %vm2333_vm0, %v2835_v38, 0.0  ;;  %v2854_v19 = vmul.f32 %v2852_v11, %v2756_v25  ;;  %v2832_v21 = vpop.f32.mrb[2].mxu0 }
 0x372   : > { %2845 = vadd.xlane.f32.xlu1 %v2844_v40  ;;  %2837 = vadd.xlane.f32.xlu0 %v2836_v44  ;;  %v3356_v22 = vpop.f32.mrb[3].mxu0  ;;  %v2848_v24 = vsel %vm2333_vm0, %v2847_v17, 0.0  ;;  %v2840_v50 = vsel %vm2333_vm0, %v2839_v18, 0.0 }
 0x373   : > { %v2855_v23 = vsel %vm2333_vm0, %v2854_v19, 0.0 }
 0x376   : > { %2849 = vadd.xlane.f32.xlu1 %v2848_v24  ;;  %2841 = vadd.xlane.f32.xlu0 %v2840_v50 }
 0x37a   : > { %2856 = vadd.xlane.f32.xlu0 %v2855_v23  ;;  %2752 = vadd.xlane.f32.xlu1 %v2751_v10 }
 0x3ff   : > { %v2846_v28 = vpop.xlane.xlu1 %2845  ;;  %v2838_v30 = vpop.xlane.xlu0 %2837 }
 0x400   : > { %v2863_v29 = vrot.slane %v2846_v28, 2 }
 0x402   : > { %v2865_v31 = vmul.f32 %v2863_v29, %v2838_v30 }
 0x403   : > { %v2842_v33 = vpop.xlane.xlu0 %2841  ;;  %v2850_v36 = vpop.xlane.xlu1 %2849 }
 0x404   : > { %v2866_v32 = vmax.f32 %v2865_v31, 1e-16  ;;  %v2858_v34 = vmul.f32 %v2842_v33, %v2838_v30 }
 0x406   : > { %v2859_v35 = vmax.f32 %v2858_v34, 1e-16  ;;  %3885 = vrsqrt.f32 %v2866_v32 }
 0x407   : > { %v2857_v25 = vpop.xlane.xlu0 %2856  ;;  %v2753_v38 = vpop.xlane.xlu1 %2752 }
 0x408   : > { %3887 = vrsqrt.f32 %v2859_v35  ;;  %v2755_v42 = vmul.f32 0.0009765625, %v2753_v38 }
 0x410   : > { %v3886_v37 = vpop.eup %3885 }
 0x411   : > { %v2868_v41 = vmul.f32 %v3886_v37, %v2857_v25 }
 0x412   : > { %v3888_v26 = vpop.eup %3887 }
 0x413   : > { %v2861_v39 = vmul.f32 %v3888_v26, %v2850_v36 }
 0x415   : > { %v2869_v40 = vsub.f32 2.0, %v2861_v39 }
 0x417   : > { %v2870_v43 = vsub.f32 %v2869_v40, %v2868_v41 }
 0x419   : > { %v2871_v44 = vadd.f32 %v2870_v43, %v2755_v42 }
 0x41b   : > { %2874 = vperm.xlu0 %3880, %v2871_v44  }
 0x49a   : > { %v2875_v45 = vpop.permute.xlu0 %2874 }
 0x49b   : > { %2877 = vst [vmem:[%s4774_s7] sm:$0x3] %v2875_v45 }
 0x49c PF: > { %s4802_s17 = sld [smem:[#allocation14_spill]]  ;;  %p18_p12 = scmp.ge.s32.totalorder %s4159_s28, 4  }
 0x49d   : > { %s4803_s24 = smov %s4073_s25  ;;  %s4804_s25 = smov %s4077_s26 }
 0x49e   : > { %s4806_s27 = smov %s4159_s28  ;;  %20 = sbr.rel (!%p18_p12) target bundleno = 7 (0x7), region = 122 }
 0x4a2   : > { %s4805_s26 = smov %s4802_s17 }
 0x4a5   :  { %2889 = vsyncpa [#allocation4], 1 }
 0x4a6   :  { %2891 = vsyncpa [#allocation4 + $0x1], 1 }
 0x4a7   :  { %2892 = vsyncpa [#allocation6], 1 }

</bundles_post_ra>
